<compile_context>
chip_gen: v7x
topology: tpu7x:2x2x1
jax: 0.10.0
libtpu: 0.0.40
codegen_flags: <defaults>
</compile_context>

<pallas_src>
import functools
import math

import jax
import jax.numpy as jnp
from jax.experimental import pallas as pl
from jax.experimental.pallas import tpu as pltpu


# ----------------------------- Pallas kernels ------------------------------ #

def _fused_kernel_a(x_ref, mask_ref, w0_ref, b0_ref, w1_ref, b1_ref,
                    w2_ref, b2_ref, o_ref, s1_ref, s2_ref, *,
                    Wc, Nc, margin, cdtype):
    """conv0 -> lrelu -> conv1 -> lrelu -> conv2 -> lrelu (one image, all in VMEM).

    Activations are (C, Nc) canvases: flattened zero-bordered (H+2)x(W+2) images
    with the pixel index on the lane axis. A 3x3 conv is a single matmul
    W[Cout, 9*Cin] @ col[9*Cin, Nc], col built from 9 shifted lane-slices of the
    margin-padded canvas.
    """
    mask = mask_ref[...]                        # (1, Nc): 1 interior / 0 border

    def conv3x3_lrelu(tap, w_ref, b_ref):
        col = jnp.concatenate(
            [tap((dh - 1) * Wc + (dw - 1)) for dh in range(3) for dw in range(3)],
            axis=0).astype(cdtype)              # (9*Cin, Nc)
        acc = jnp.dot(w_ref[...], col, preferred_element_type=jnp.float32)
        acc = acc + b_ref[...]                  # (Cout, 1) lane-broadcast, f32
        acc = jnp.where(acc >= 0.0, acc, 0.1 * acc)
        return acc * mask                       # re-zero border == next layer's padding

    a = conv3x3_lrelu(lambda s: x_ref[0, :, margin + s: margin + s + Nc],
                      w0_ref, b0_ref)
    s1_ref[...] = jnp.zeros_like(s1_ref)
    s1_ref[:, margin:margin + Nc] = a
    a = conv3x3_lrelu(lambda s: s1_ref[:, margin + s: margin + s + Nc],
                      w1_ref, b1_ref)
    s2_ref[...] = jnp.zeros_like(s2_ref)
    s2_ref[:, margin:margin + Nc] = a
    a = conv3x3_lrelu(lambda s: s2_ref[:, margin + s: margin + s + Nc],
                      w2_ref, b2_ref)
    o_ref[0] = a.astype(o_ref.dtype)


def _fused_kernel_b(p_ref, res_ref, mask_ref, w3_ref, b3_ref, w4_ref, b4_ref,
                    w5_ref, b5_ref, w6_ref, b6_ref, o_ref, s1_ref, s2_ref, *,
                    Wc, Nc, margin, cdtype):
    """conv3(4x4,s2) -> conv4 -> conv5 (lrelu each) -> conv6(1x1) + avg-pool residual."""
    mask = mask_ref[...]                        # (1, Nc) on the half-res canvas

    # conv3: 16 shifted taps over the 4 polyphase canvases (K = 16*nf, one matmul).
    col = jnp.concatenate(
        [p_ref[0, rs, :,
               margin + (a - 1) * Wc + (b - 1):
               margin + (a - 1) * Wc + (b - 1) + Nc]
         for rs in range(4) for a in range(2) for b in range(2)],
        axis=0).astype(cdtype)
    acc = jnp.dot(w3_ref[...], col, preferred_element_type=jnp.float32)
    acc = acc + b3_ref[...]
    acc = jnp.where(acc >= 0.0, acc, 0.1 * acc) * mask

    s1_ref[...] = jnp.zeros_like(s1_ref)
    s1_ref[:, margin:margin + Nc] = acc

    def conv3x3_lrelu(src_ref, w_ref, b_ref):
        c = jnp.concatenate(
            [src_ref[:, margin + (dh - 1) * Wc + (dw - 1):
                        margin + (dh - 1) * Wc + (dw - 1) + Nc]
             for dh in range(3) for dw in range(3)],
            axis=0).astype(cdtype)
        y = jnp.dot(w_ref[...], c, preferred_element_type=jnp.float32)
        y = y + b_ref[...]
        return jnp.where(y >= 0.0, y, 0.1 * y) * mask

    a4 = conv3x3_lrelu(s1_ref, w4_ref, b4_ref)          # (2nf, Nc)
    s2_ref[...] = jnp.zeros_like(s2_ref)
    s2_ref[:, margin:margin + Nc] = a4
    a5 = conv3x3_lrelu(s2_ref, w5_ref, b5_ref)          # (nf, Nc)

    # conv6 (1x1) + residual; lane-dense store, border cropped by the wrapper.
    out = jnp.dot(w6_ref[...], a5.astype(cdtype), preferred_element_type=jnp.float32)
    out = out + b6_ref[...] + res_ref[0]
    o_ref[0] = out.astype(o_ref.dtype)


# ------------------------------ JAX wrapper --------------------------------- #

def _round_up(x, m):
    return ((x + m - 1) // m) * m


def _border_mask(hc, wc):
    m = jnp.zeros((hc, wc), jnp.float32).at[1:hc - 1, 1:wc - 1].set(1.0)
    return m.reshape(1, hc * wc)


def _wmat_3x3(w, cdtype):
    # (3, 3, Cin, Cout) -> (Cout, 9*Cin), K ordered (kh, kw, cin) to match the kernel.
    cout = w.shape[-1]
    return jnp.transpose(w, (3, 0, 1, 2)).reshape(cout, -1).astype(cdtype)


def _bias_col(b):
    return b.reshape(-1, 1).astype(jnp.float32)


def direct_kernel_estimator(x, params, *, compute_dtype=jnp.float32):
    """Forward pass of DirectKernelEstimator. x: (B, 3, H, W) -> (B, 3, H/2, W/2)."""
    x = x.astype(jnp.float32)
    B, cin, H, W = x.shape
    assert cin == 3 and H % 2 == 0 and W % 2 == 0
    (w0, b0), (w1, b1), (w2, b2), (w3, b3), (w4, b4), (w5, b5), (w6, b6) = params
    nf = w0.shape[-1]
    Ho, Wo = H // 2, W // 2
    cdt = compute_dtype

    # Canvas geometry: zero-bordered (H+2, W+2) images flattened on the lane axis,
    # plus a 128-aligned margin so shifted tap slices never go out of bounds.
    Hc1, Wc1 = H + 2, W + 2
    Nc1 = Hc1 * Wc1
    m1 = _round_up(Wc1 + 1, 128)
    Hc2, Wc2 = Ho + 2, Wo + 2
    Nc2 = Hc2 * Wc2
    m2 = _round_up(Wc2 + 1, 128)

    # ---- weights as (Cout, taps*Cin) matmul operands (taps folded into K) ----
    c0 = 8                                                   # pad 3 input ch -> 8
    w0m = _wmat_3x3(jnp.pad(w0, ((0, 0), (0, 0), (0, c0 - 3), (0, 0))), cdt)
    w1m = _wmat_3x3(w1, cdt)
    w2m = _wmat_3x3(w2, cdt)
    w4m = _wmat_3x3(w4, cdt)
    w5m = _wmat_3x3(w5, cdt)
    # conv3 (4x4, stride 2) via polyphase: K ordered (r, s, a, b, cin).
    blocks = [jnp.transpose(w3[2 * a + r, 2 * b + s], (1, 0))
              for r in range(2) for s in range(2)
              for a in range(2) for b in range(2)]
    w3m = jnp.concatenate(blocks, axis=1).astype(cdt)        # (2nf, 16*nf)
    w6m = jnp.transpose(w6[0, 0], (1, 0)).astype(cdt)        # (3, nf)

    # ---- stage-1 input: 8-channel zero-bordered flattened canvas ----
    xc = jnp.pad(x, ((0, 0), (0, c0 - 3), (0, 0), (0, 0)))
    xc = jnp.pad(xc, ((0, 0), (0, 0), (1, 1), (1, 1))).reshape(B, c0, Nc1)
    xc = jnp.pad(xc, ((0, 0), (0, 0), (m1, m1)))
    mask1 = _border_mask(Hc1, Wc1)

    flops_a = 2 * B * Nc1 * nf * (9 * c0 + 9 * nf + 9 * nf)
    bytes_a = 4 * (xc.size + B * nf * Nc1 + mask1.size) \
        + sum(int(a.size) * a.dtype.itemsize for a in (w0m, w1m, w2m))
    kern_a = functools.partial(_fused_kernel_a, Wc=Wc1, Nc=Nc1, margin=m1, cdtype=cdt)
    fea = pl.pallas_call(
        kern_a,
        out_shape=jax.ShapeDtypeStruct((B, nf, Nc1), jnp.float32),
        grid=(B,),
        in_specs=[
            pl.BlockSpec((1, c0, Nc1 + 2 * m1), lambda i: (i, 0, 0)),
            pl.BlockSpec((1, Nc1), lambda i: (0, 0)),
            pl.BlockSpec(w0m.shape, lambda i: (0, 0)),
            pl.BlockSpec((nf, 1), lambda i: (0, 0)),
            pl.BlockSpec(w1m.shape, lambda i: (0, 0)),
            pl.BlockSpec((nf, 1), lambda i: (0, 0)),
            pl.BlockSpec(w2m.shape, lambda i: (0, 0)),
            pl.BlockSpec((nf, 1), lambda i: (0, 0)),
        ],
        out_specs=pl.BlockSpec((1, nf, Nc1), lambda i: (i, 0, 0)),
        scratch_shapes=[pltpu.VMEM((nf, Nc1 + 2 * m1), jnp.float32),
                        pltpu.VMEM((nf, Nc1 + 2 * m1), jnp.float32)],
        compiler_params=pltpu.CompilerParams(dimension_semantics=("parallel",)),
        cost_estimate=pl.CostEstimate(flops=flops_a, transcendentals=0,
                                      bytes_accessed=bytes_a),
    )(xc, mask1, w0m, _bias_col(b0), w1m, _bias_col(b1), w2m, _bias_col(b2))

    # ---- stage-2 inputs ----
    # Polyphase (space-to-depth) of the zero-bordered conv2 canvas: turns the
    # 4x4/stride-2 conv3 into 16 stride-1 taps over 4 quarter-res canvases.
    fcan = fea.reshape(B, nf, Hc1, Wc1)
    phases = []
    for r in range(2):
        for s in range(2):
            p = fcan[:, :, r::2, s::2]                         # (B, nf, Ho+1, Wo+1)
            p = jnp.pad(p, ((0, 0), (0, 0), (0, 1), (0, 1)))   # -> (B, nf, Hc2, Wc2)
            phases.append(p.reshape(B, nf, Nc2))
    pcan = jnp.stack(phases, axis=1)                           # (B, 4, nf, Nc2)
    pcan = jnp.pad(pcan, ((0, 0), (0, 0), (0, 0), (m2, m2)))

    # F.avg_pool2d(x, 2) residual, embedded into the stage-2 output canvas.
    small = x.reshape(B, 3, Ho, 2, Wo, 2).mean(axis=(3, 5))
    resc = jnp.pad(small, ((0, 0), (0, 0), (1, 1), (1, 1))).reshape(B, 3, Nc2)
    mask2 = _border_mask(Hc2, Wc2)

    flops_b = 2 * B * Nc2 * (16 * nf * 2 * nf + 18 * nf * 2 * nf + 18 * nf * nf + nf * 3)
    bytes_b = 4 * (pcan.size + resc.size + B * 3 * Nc2 + mask2.size) \
        + sum(int(a.size) * a.dtype.itemsize for a in (w3m, w4m, w5m, w6m))
    kern_b = functools.partial(_fused_kernel_b, Wc=Wc2, Nc=Nc2, margin=m2, cdtype=cdt)
    out = pl.pallas_call(
        kern_b,
        out_shape=jax.ShapeDtypeStruct((B, 3, Nc2), jnp.float32),
        grid=(B,),
        in_specs=[
            pl.BlockSpec((1, 4, nf, Nc2 + 2 * m2), lambda i: (i, 0, 0, 0)),
            pl.BlockSpec((1, 3, Nc2), lambda i: (i, 0, 0)),
            pl.BlockSpec((1, Nc2), lambda i: (0, 0)),
            pl.BlockSpec(w3m.shape, lambda i: (0, 0)),
            pl.BlockSpec((2 * nf, 1), lambda i: (0, 0)),
            pl.BlockSpec(w4m.shape, lambda i: (0, 0)),
            pl.BlockSpec((2 * nf, 1), lambda i: (0, 0)),
            pl.BlockSpec(w5m.shape, lambda i: (0, 0)),
            pl.BlockSpec((nf, 1), lambda i: (0, 0)),
            pl.BlockSpec(w6m.shape, lambda i: (0, 0)),
            pl.BlockSpec((3, 1), lambda i: (0, 0)),
        ],
        out_specs=pl.BlockSpec((1, 3, Nc2), lambda i: (i, 0, 0)),
        scratch_shapes=[pltpu.VMEM((2 * nf, Nc2 + 2 * m2), jnp.float32),
                        pltpu.VMEM((2 * nf, Nc2 + 2 * m2), jnp.float32)],
        compiler_params=pltpu.CompilerParams(dimension_semantics=("parallel",)),
        cost_estimate=pl.CostEstimate(flops=flops_b, transcendentals=0,
                                      bytes_accessed=bytes_b),
    )(pcan, resc, mask2, w3m, _bias_col(b3), w4m, _bias_col(b4),
      w5m, _bias_col(b5), w6m, _bias_col(b6))

    out = out.reshape(B, 3, Hc2, Wc2)[:, :, 1:1 + Ho, 1:1 + Wo]
    return out


# -------------------------- synthetic parameters ---------------------------- #

def init_params(nf, key):
    """Deterministic synthetic weights, stored as (kh, kw, Cin, Cout) == HWIO."""
    specs = [
        (3, 3, nf),            # conv0
        (3, nf, nf),           # conv1
        (3, nf, nf),           # conv2
        (4, nf, 2 * nf),       # conv3 (stride 2)
        (3, 2 * nf, 2 * nf),   # conv4
        (3, 2 * nf, nf),       # conv5
        (1, nf, 3),            # conv6 (1x1)
    ]
    params = []
    for k, cin, cout in specs:
        key, wk, bk = jax.random.split(key, 3)
        fan_in = k * k * cin
        w = jax.random.normal(wk, (k, k, cin, cout), jnp.float32) / math.sqrt(fan_in)
        b = 0.01 * jax.random.normal(bk, (cout,), jnp.float32)
        params.append((w, b))
    return params


# --------------------------- pure-JAX reference ----------------------------- #

def _ref_forward(x, params):
    x = x.astype(jnp.float32)
    B, _, H, W = x.shape

    def conv(h, w, b, stride, pad):
        y = jax.lax.conv_general_dilated(
            h, w, window_strides=(stride, stride),
            padding=[(pad, pad), (pad, pad)],
            dimension_numbers=("NCHW", "HWIO", "NCHW"))
        return y + b[None, :, None, None]

    def lrelu(y):
        return jnp.where(y >= 0, y, 0.1 * y)

    (w0, b0), (w1, b1), (w2, b2), (w3, b3), (w4, b4), (w5, b5), (w6, b6) = params
    fea = lrelu(conv(x, w0, b0, 1, 1))
    fea = lrelu(conv(fea, w1, b1, 1, 1))
    fea = lrelu(conv(fea, w2, b2, 1, 1))
    fea = lrelu(conv(fea, w3, b3, 2, 1))
    fea = lrelu(conv(fea, w4, b4, 1, 1))
    fea = lrelu(conv(fea, w5, b5, 1, 1))
    fea = conv(fea, w6, b6, 1, 0)
    small_x = x.reshape(B, 3, H // 2, 2, W // 2, 2).mean(axis=(3, 5))
    return fea + small_x


# --------------------------------- main -------------------------------------- #

if __name__ == "__main__":
    nf = 8
    B, C, H, W = 2, 3, 16, 16

    root = jax.random.PRNGKey(0)
    xkey, pkey = jax.random.split(root)
    x = jax.random.normal(xkey, (B, C, H, W), jnp.float32)
    params = init_params(nf, pkey)

    ref = jax.block_until_ready(_ref_forward(x, params))

    # f32 path (strict check).
    fwd_f32 = jax.jit(functools.partial(direct_kernel_estimator,
                                        compute_dtype=jnp.float32))
    out = jax.block_until_ready(fwd_f32(x, params))
    assert out.shape == (B, 3, H // 2, W // 2), out.shape
    if not bool(jnp.allclose(out, ref, atol=5e-3, rtol=5e-3)):
        raise AssertionError("Pallas f32 output does not match JAX reference")

    # bf16 MXU-operand path (v6e/v7x): bf16 weights + col, f32 accumulate/epilogue.
    fwd_bf16 = jax.jit(functools.partial(direct_kernel_estimator,
                                         compute_dtype=jnp.bfloat16))
    out_bf = jax.block_until_ready(fwd_bf16(x, params))
    if not bool(jnp.allclose(out_bf, ref, atol=1e-1, rtol=1e-1)):
        raise AssertionError("Pallas bf16 output does not match JAX reference")

    print("KERNEL_OK")
</pallas_src>

<mosaic_0001>
module attributes {stable_mosaic.version = 11 : i64} {
  func.func @_fused_kernel_a(%arg0: i32, %arg1: memref<1x8x580xf32, #tpu.memory_space<vmem>>, %arg2: memref<1x324xf32, #tpu.memory_space<vmem>>, %arg3: memref<8x72xf32, #tpu.memory_space<vmem>>, %arg4: memref<8x1xf32, #tpu.memory_space<vmem>>, %arg5: memref<8x72xf32, #tpu.memory_space<vmem>>, %arg6: memref<8x1xf32, #tpu.memory_space<vmem>>, %arg7: memref<8x72xf32, #tpu.memory_space<vmem>>, %arg8: memref<8x1xf32, #tpu.memory_space<vmem>>, %arg9: memref<1x8x324xf32, #tpu.memory_space<vmem>>, %arg10: memref<8x580xf32, #tpu.memory_space<vmem>>, %arg11: memref<8x580xf32, #tpu.memory_space<vmem>>) attributes {dimension_semantics = [#tpu.dimension_semantics<parallel>], iteration_bounds = array<i64: 2>, scalar_prefetch = 0 : i64, scratch_operands = 2 : i64, tpu.core_type = #tpu.core_type<tc>, window_params = [{transform_indices = @transform_0, window_bounds = array<i64: 1, 8, 580>}, {pipeline_mode = #tpu.pipeline_mode<synchronous>, transform_indices = @transform_1, window_bounds = array<i64: 1, 324>}, {pipeline_mode = #tpu.pipeline_mode<synchronous>, transform_indices = @transform_2, window_bounds = array<i64: 8, 72>}, {pipeline_mode = #tpu.pipeline_mode<synchronous>, transform_indices = @transform_3, window_bounds = array<i64: 8, 1>}, {pipeline_mode = #tpu.pipeline_mode<synchronous>, transform_indices = @transform_4, window_bounds = array<i64: 8, 72>}, {pipeline_mode = #tpu.pipeline_mode<synchronous>, transform_indices = @transform_5, window_bounds = array<i64: 8, 1>}, {pipeline_mode = #tpu.pipeline_mode<synchronous>, transform_indices = @transform_6, window_bounds = array<i64: 8, 72>}, {pipeline_mode = #tpu.pipeline_mode<synchronous>, transform_indices = @transform_7, window_bounds = array<i64: 8, 1>}, {transform_indices = @transform_8, window_bounds = array<i64: 1, 8, 324>}]} {
    %c0 = arith.constant 0 : index
    %c0_0 = arith.constant 0 : index
    %0 = vector.load %arg2[%c0, %c0_0] : memref<1x324xf32, #tpu.memory_space<vmem>>, vector<1x324xf32>
    %c0_1 = arith.constant 0 : index
    %c0_2 = arith.constant 0 : index
    %c109 = arith.constant 109 : index
    %1 = vector.load %arg1[%c0_1, %c0_2, %c109] : memref<1x8x580xf32, #tpu.memory_space<vmem>>, vector<1x8x324xf32>
    %2 = vector.shape_cast %1 : vector<1x8x324xf32> to vector<8x324xf32>
    %c0_3 = arith.constant 0 : index
    %c0_4 = arith.constant 0 : index
    %c110 = arith.constant 110 : index
    %3 = vector.load %arg1[%c0_3, %c0_4, %c110] : memref<1x8x580xf32, #tpu.memory_space<vmem>>, vector<1x8x324xf32>
    %4 = vector.shape_cast %3 : vector<1x8x324xf32> to vector<8x324xf32>
    %c0_5 = arith.constant 0 : index
    %c0_6 = arith.constant 0 : index
    %c111 = arith.constant 111 : index
    %5 = vector.load %arg1[%c0_5, %c0_6, %c111] : memref<1x8x580xf32, #tpu.memory_space<vmem>>, vector<1x8x324xf32>
    %6 = vector.shape_cast %5 : vector<1x8x324xf32> to vector<8x324xf32>
    %c0_7 = arith.constant 0 : index
    %c0_8 = arith.constant 0 : index
    %c127 = arith.constant 127 : index
    %7 = vector.load %arg1[%c0_7, %c0_8, %c127] : memref<1x8x580xf32, #tpu.memory_space<vmem>>, vector<1x8x324xf32>
    %8 = vector.shape_cast %7 : vector<1x8x324xf32> to vector<8x324xf32>
    %c0_9 = arith.constant 0 : index
    %c0_10 = arith.constant 0 : index
    %c128 = arith.constant 128 : index
    %9 = vector.load %arg1[%c0_9, %c0_10, %c128] : memref<1x8x580xf32, #tpu.memory_space<vmem>>, vector<1x8x324xf32>
    %10 = vector.shape_cast %9 : vector<1x8x324xf32> to vector<8x324xf32>
    %c0_11 = arith.constant 0 : index
    %c0_12 = arith.constant 0 : index
    %c129 = arith.constant 129 : index
    %11 = vector.load %arg1[%c0_11, %c0_12, %c129] : memref<1x8x580xf32, #tpu.memory_space<vmem>>, vector<1x8x324xf32>
    %12 = vector.shape_cast %11 : vector<1x8x324xf32> to vector<8x324xf32>
    %c0_13 = arith.constant 0 : index
    %c0_14 = arith.constant 0 : index
    %c145 = arith.constant 145 : index
    %13 = vector.load %arg1[%c0_13, %c0_14, %c145] : memref<1x8x580xf32, #tpu.memory_space<vmem>>, vector<1x8x324xf32>
    %14 = vector.shape_cast %13 : vector<1x8x324xf32> to vector<8x324xf32>
    %c0_15 = arith.constant 0 : index
    %c0_16 = arith.constant 0 : index
    %c146 = arith.constant 146 : index
    %15 = vector.load %arg1[%c0_15, %c0_16, %c146] : memref<1x8x580xf32, #tpu.memory_space<vmem>>, vector<1x8x324xf32>
    %16 = vector.shape_cast %15 : vector<1x8x324xf32> to vector<8x324xf32>
    %c0_17 = arith.constant 0 : index
    %c0_18 = arith.constant 0 : index
    %c147 = arith.constant 147 : index
    %17 = vector.load %arg1[%c0_17, %c0_18, %c147] : memref<1x8x580xf32, #tpu.memory_space<vmem>>, vector<1x8x324xf32>
    %18 = vector.shape_cast %17 : vector<1x8x324xf32> to vector<8x324xf32>
    %19 = tpu.concatenate %2, %4, %6, %8, %10, %12, %14, %16, %18 in 0 : vector<8x324xf32>, vector<8x324xf32>, vector<8x324xf32>, vector<8x324xf32>, vector<8x324xf32>, vector<8x324xf32>, vector<8x324xf32>, vector<8x324xf32>, vector<8x324xf32> -> vector<72x324xf32>
    %c0_19 = arith.constant 0 : index
    %c0_20 = arith.constant 0 : index
    %20 = vector.load %arg3[%c0_19, %c0_20] : memref<8x72xf32, #tpu.memory_space<vmem>>, vector<8x72xf32>
    %cst = arith.constant dense<0.000000e+00> : vector<8x324xf32>
    %21 = tpu.matmul %20, %19, %cst {dimension_numbers = #tpu.dot_dimension_numbers<[1], [0], [0], [1], [0, 0, 1, 1], [], []>} : vector<8x72xf32>, vector<72x324xf32>, vector<8x324xf32> -> vector<8x324xf32>
    %c0_21 = arith.constant 0 : index
    %c0_22 = arith.constant 0 : index
    %22 = vector.load %arg4[%c0_21, %c0_22] : memref<8x1xf32, #tpu.memory_space<vmem>>, vector<8x1xf32>
    %23 = vector.broadcast %22 : vector<8x1xf32> to vector<8x324xf32>
    %24 = arith.addf %21, %23 : vector<8x324xf32>
    %cst_23 = arith.constant 0.000000e+00 : f32
    %25 = vector.broadcast %cst_23 : f32 to vector<8x324xf32>
    %26 = arith.cmpf oge, %24, %25 : vector<8x324xf32>
    %cst_24 = arith.constant 1.000000e-01 : f32
    %27 = vector.broadcast %cst_24 : f32 to vector<8x324xf32>
    %28 = arith.mulf %27, %24 : vector<8x324xf32>
    %29 = arith.select %26, %24, %28 : vector<8x324xi1>, vector<8x324xf32>
    %30 = vector.broadcast %0 : vector<1x324xf32> to vector<8x324xf32>
    %31 = arith.mulf %29, %30 : vector<8x324xf32>
    %cst_25 = arith.constant 0.000000e+00 : f32
    %32 = vector.broadcast %cst_25 : f32 to vector<8x580xf32>
    %c0_26 = arith.constant 0 : index
    %c0_27 = arith.constant 0 : index
    %33 = vector.load %arg10[%c0_26, %c0_27] : memref<8x580xf32, #tpu.memory_space<vmem>>, vector<8x580xf32>
    tpu.vector_store %arg10[%c0_26, %c0_27], %32 {strides = array<i32>} : memref<8x580xf32, #tpu.memory_space<vmem>>, vector<8x580xf32>,
    %c0_28 = arith.constant 0 : index
    %c128_29 = arith.constant 128 : index
    %34 = vector.load %arg10[%c0_28, %c128_29] : memref<8x580xf32, #tpu.memory_space<vmem>>, vector<8x324xf32>
    tpu.vector_store %arg10[%c0_28, %c128_29], %31 {strides = array<i32>} : memref<8x580xf32, #tpu.memory_space<vmem>>, vector<8x324xf32>,
    %c0_30 = arith.constant 0 : index
    %c109_31 = arith.constant 109 : index
    %35 = vector.load %arg10[%c0_30, %c109_31] : memref<8x580xf32, #tpu.memory_space<vmem>>, vector<8x324xf32>
    %c0_32 = arith.constant 0 : index
    %c110_33 = arith.constant 110 : index
    %36 = vector.load %arg10[%c0_32, %c110_33] : memref<8x580xf32, #tpu.memory_space<vmem>>, vector<8x324xf32>
    %c0_34 = arith.constant 0 : index
    %c111_35 = arith.constant 111 : index
    %37 = vector.load %arg10[%c0_34, %c111_35] : memref<8x580xf32, #tpu.memory_space<vmem>>, vector<8x324xf32>
    %c0_36 = arith.constant 0 : index
    %c127_37 = arith.constant 127 : index
    %38 = vector.load %arg10[%c0_36, %c127_37] : memref<8x580xf32, #tpu.memory_space<vmem>>, vector<8x324xf32>
    %c0_38 = arith.constant 0 : index
    %c128_39 = arith.constant 128 : index
    %39 = vector.load %arg10[%c0_38, %c128_39] : memref<8x580xf32, #tpu.memory_space<vmem>>, vector<8x324xf32>
    %c0_40 = arith.constant 0 : index
    %c129_41 = arith.constant 129 : index
    %40 = vector.load %arg10[%c0_40, %c129_41] : memref<8x580xf32, #tpu.memory_space<vmem>>, vector<8x324xf32>
    %c0_42 = arith.constant 0 : index
    %c145_43 = arith.constant 145 : index
    %41 = vector.load %arg10[%c0_42, %c145_43] : memref<8x580xf32, #tpu.memory_space<vmem>>, vector<8x324xf32>
    %c0_44 = arith.constant 0 : index
    %c146_45 = arith.constant 146 : index
    %42 = vector.load %arg10[%c0_44, %c146_45] : memref<8x580xf32, #tpu.memory_space<vmem>>, vector<8x324xf32>
    %c0_46 = arith.constant 0 : index
    %c147_47 = arith.constant 147 : index
    %43 = vector.load %arg10[%c0_46, %c147_47] : memref<8x580xf32, #tpu.memory_space<vmem>>, vector<8x324xf32>
    %44 = tpu.concatenate %35, %36, %37, %38, %39, %40, %41, %42, %43 in 0 : vector<8x324xf32>, vector<8x324xf32>, vector<8x324xf32>, vector<8x324xf32>, vector<8x324xf32>, vector<8x324xf32>, vector<8x324xf32>, vector<8x324xf32>, vector<8x324xf32> -> vector<72x324xf32>
    %c0_48 = arith.constant 0 : index
    %c0_49 = arith.constant 0 : index
    %45 = vector.load %arg5[%c0_48, %c0_49] : memref<8x72xf32, #tpu.memory_space<vmem>>, vector<8x72xf32>
    %cst_50 = arith.constant dense<0.000000e+00> : vector<8x324xf32>
    %46 = tpu.matmul %45, %44, %cst_50 {dimension_numbers = #tpu.dot_dimension_numbers<[1], [0], [0], [1], [0, 0, 1, 1], [], []>} : vector<8x72xf32>, vector<72x324xf32>, vector<8x324xf32> -> vector<8x324xf32>
    %c0_51 = arith.constant 0 : index
    %c0_52 = arith.constant 0 : index
    %47 = vector.load %arg6[%c0_51, %c0_52] : memref<8x1xf32, #tpu.memory_space<vmem>>, vector<8x1xf32>
    %48 = vector.broadcast %47 : vector<8x1xf32> to vector<8x324xf32>
    %49 = arith.addf %46, %48 : vector<8x324xf32>
    %cst_53 = arith.constant 0.000000e+00 : f32
    %50 = vector.broadcast %cst_53 : f32 to vector<8x324xf32>
    %51 = arith.cmpf oge, %49, %50 : vector<8x324xf32>
    %cst_54 = arith.constant 1.000000e-01 : f32
    %52 = vector.broadcast %cst_54 : f32 to vector<8x324xf32>
    %53 = arith.mulf %52, %49 : vector<8x324xf32>
    %54 = arith.select %51, %49, %53 : vector<8x324xi1>, vector<8x324xf32>
    %55 = vector.broadcast %0 : vector<1x324xf32> to vector<8x324xf32>
    %56 = arith.mulf %54, %55 : vector<8x324xf32>
    %cst_55 = arith.constant 0.000000e+00 : f32
    %57 = vector.broadcast %cst_55 : f32 to vector<8x580xf32>
    %c0_56 = arith.constant 0 : index
    %c0_57 = arith.constant 0 : index
    %58 = vector.load %arg11[%c0_56, %c0_57] : memref<8x580xf32, #tpu.memory_space<vmem>>, vector<8x580xf32>
    tpu.vector_store %arg11[%c0_56, %c0_57], %57 {strides = array<i32>} : memref<8x580xf32, #tpu.memory_space<vmem>>, vector<8x580xf32>,
    %c0_58 = arith.constant 0 : index
    %c128_59 = arith.constant 128 : index
    %59 = vector.load %arg11[%c0_58, %c128_59] : memref<8x580xf32, #tpu.memory_space<vmem>>, vector<8x324xf32>
    tpu.vector_store %arg11[%c0_58, %c128_59], %56 {strides = array<i32>} : memref<8x580xf32, #tpu.memory_space<vmem>>, vector<8x324xf32>,
    %c0_60 = arith.constant 0 : index
    %c109_61 = arith.constant 109 : index
    %60 = vector.load %arg11[%c0_60, %c109_61] : memref<8x580xf32, #tpu.memory_space<vmem>>, vector<8x324xf32>
    %c0_62 = arith.constant 0 : index
    %c110_63 = arith.constant 110 : index
    %61 = vector.load %arg11[%c0_62, %c110_63] : memref<8x580xf32, #tpu.memory_space<vmem>>, vector<8x324xf32>
    %c0_64 = arith.constant 0 : index
    %c111_65 = arith.constant 111 : index
    %62 = vector.load %arg11[%c0_64, %c111_65] : memref<8x580xf32, #tpu.memory_space<vmem>>, vector<8x324xf32>
    %c0_66 = arith.constant 0 : index
    %c127_67 = arith.constant 127 : index
    %63 = vector.load %arg11[%c0_66, %c127_67] : memref<8x580xf32, #tpu.memory_space<vmem>>, vector<8x324xf32>
    %c0_68 = arith.constant 0 : index
    %c128_69 = arith.constant 128 : index
    %64 = vector.load %arg11[%c0_68, %c128_69] : memref<8x580xf32, #tpu.memory_space<vmem>>, vector<8x324xf32>
    %c0_70 = arith.constant 0 : index
    %c129_71 = arith.constant 129 : index
    %65 = vector.load %arg11[%c0_70, %c129_71] : memref<8x580xf32, #tpu.memory_space<vmem>>, vector<8x324xf32>
    %c0_72 = arith.constant 0 : index
    %c145_73 = arith.constant 145 : index
    %66 = vector.load %arg11[%c0_72, %c145_73] : memref<8x580xf32, #tpu.memory_space<vmem>>, vector<8x324xf32>
    %c0_74 = arith.constant 0 : index
    %c146_75 = arith.constant 146 : index
    %67 = vector.load %arg11[%c0_74, %c146_75] : memref<8x580xf32, #tpu.memory_space<vmem>>, vector<8x324xf32>
    %c0_76 = arith.constant 0 : index
    %c147_77 = arith.constant 147 : index
    %68 = vector.load %arg11[%c0_76, %c147_77] : memref<8x580xf32, #tpu.memory_space<vmem>>, vector<8x324xf32>
    %69 = tpu.concatenate %60, %61, %62, %63, %64, %65, %66, %67, %68 in 0 : vector<8x324xf32>, vector<8x324xf32>, vector<8x324xf32>, vector<8x324xf32>, vector<8x324xf32>, vector<8x324xf32>, vector<8x324xf32>, vector<8x324xf32>, vector<8x324xf32> -> vector<72x324xf32>
    %c0_78 = arith.constant 0 : index
    %c0_79 = arith.constant 0 : index
    %70 = vector.load %arg7[%c0_78, %c0_79] : memref<8x72xf32, #tpu.memory_space<vmem>>, vector<8x72xf32>
    %cst_80 = arith.constant dense<0.000000e+00> : vector<8x324xf32>
    %71 = tpu.matmul %70, %69, %cst_80 {dimension_numbers = #tpu.dot_dimension_numbers<[1], [0], [0], [1], [0, 0, 1, 1], [], []>} : vector<8x72xf32>, vector<72x324xf32>, vector<8x324xf32> -> vector<8x324xf32>
    %c0_81 = arith.constant 0 : index
    %c0_82 = arith.constant 0 : index
    %72 = vector.load %arg8[%c0_81, %c0_82] : memref<8x1xf32, #tpu.memory_space<vmem>>, vector<8x1xf32>
    %73 = vector.broadcast %72 : vector<8x1xf32> to vector<8x324xf32>
    %74 = arith.addf %71, %73 : vector<8x324xf32>
    %cst_83 = arith.constant 0.000000e+00 : f32
    %75 = vector.broadcast %cst_83 : f32 to vector<8x324xf32>
    %76 = arith.cmpf oge, %74, %75 : vector<8x324xf32>
    %cst_84 = arith.constant 1.000000e-01 : f32
    %77 = vector.broadcast %cst_84 : f32 to vector<8x324xf32>
    %78 = arith.mulf %77, %74 : vector<8x324xf32>
    %79 = arith.select %76, %74, %78 : vector<8x324xi1>, vector<8x324xf32>
    %80 = vector.broadcast %0 : vector<1x324xf32> to vector<8x324xf32>
    %81 = arith.mulf %79, %80 : vector<8x324xf32>
    %c0_85 = arith.constant 0 : index
    %c0_86 = arith.constant 0 : index
    %c0_87 = arith.constant 0 : index
    %82 = vector.load %arg9[%c0_85, %c0_86, %c0_87] : memref<1x8x324xf32, #tpu.memory_space<vmem>>, vector<1x8x324xf32>
    %83 = vector.shape_cast %82 : vector<1x8x324xf32> to vector<8x324xf32>
    %84 = vector.shape_cast %81 : vector<8x324xf32> to vector<1x8x324xf32>
    tpu.vector_store %arg9[%c0_85, %c0_86, %c0_87], %84 {strides = array<i32>} : memref<1x8x324xf32, #tpu.memory_space<vmem>>, vector<1x8x324xf32>,
    return
  }
  func.func @transform_0(%arg0: i32) -> (i32, i32, i32) {
    %c0_i32 = arith.constant 0 : i32
    %c0_i32_0 = arith.constant 0 : i32
    %c0_i32_1 = arith.constant 0 : i32
    return %arg0, %c0_i32, %c0_i32_0 : i32, i32, i32
  }
  func.func @transform_1(%arg0: i32) -> (i32, i32) {
    %c0_i32 = arith.constant 0 : i32
    %c0_i32_0 = arith.constant 0 : i32
    %c0_i32_1 = arith.constant 0 : i32
    return %c0_i32, %c0_i32_0 : i32, i32
  }
  func.func @transform_2(%arg0: i32) -> (i32, i32) {
    %c0_i32 = arith.constant 0 : i32
    %c0_i32_0 = arith.constant 0 : i32
    %c0_i32_1 = arith.constant 0 : i32
    return %c0_i32, %c0_i32_0 : i32, i32
  }
  func.func @transform_3(%arg0: i32) -> (i32, i32) {
    %c0_i32 = arith.constant 0 : i32
    %c0_i32_0 = arith.constant 0 : i32
    %c0_i32_1 = arith.constant 0 : i32
    return %c0_i32, %c0_i32_0 : i32, i32
  }
  func.func @transform_4(%arg0: i32) -> (i32, i32) {
    %c0_i32 = arith.constant 0 : i32
    %c0_i32_0 = arith.constant 0 : i32
    %c0_i32_1 = arith.constant 0 : i32
    return %c0_i32, %c0_i32_0 : i32, i32
  }
  func.func @transform_5(%arg0: i32) -> (i32, i32) {
    %c0_i32 = arith.constant 0 : i32
    %c0_i32_0 = arith.constant 0 : i32
    %c0_i32_1 = arith.constant 0 : i32
    return %c0_i32, %c0_i32_0 : i32, i32
  }
  func.func @transform_6(%arg0: i32) -> (i32, i32) {
    %c0_i32 = arith.constant 0 : i32
    %c0_i32_0 = arith.constant 0 : i32
    %c0_i32_1 = arith.constant 0 : i32
    return %c0_i32, %c0_i32_0 : i32, i32
  }
  func.func @transform_7(%arg0: i32) -> (i32, i32) {
    %c0_i32 = arith.constant 0 : i32
    %c0_i32_0 = arith.constant 0 : i32
    %c0_i32_1 = arith.constant 0 : i32
    return %c0_i32, %c0_i32_0 : i32, i32
  }
  func.func @transform_8(%arg0: i32) -> (i32, i32, i32) {
    %c0_i32 = arith.constant 0 : i32
    %c0_i32_0 = arith.constant 0 : i32
    %c0_i32_1 = arith.constant 0 : i32
    return %arg0, %c0_i32, %c0_i32_0 : i32, i32, i32
  }
}

module attributes {stable_mosaic.version = 11 : i64} {
  func.func @_fused_kernel_b(%arg0: i32, %arg1: memref<1x4x8x356xf32, #tpu.memory_space<vmem>>, %arg2: memref<1x3x100xf32, #tpu.memory_space<vmem>>, %arg3: memref<1x100xf32, #tpu.memory_space<vmem>>, %arg4: memref<16x128xf32, #tpu.memory_space<vmem>>, %arg5: memref<16x1xf32, #tpu.memory_space<vmem>>, %arg6: memref<16x144xf32, #tpu.memory_space<vmem>>, %arg7: memref<16x1xf32, #tpu.memory_space<vmem>>, %arg8: memref<8x144xf32, #tpu.memory_space<vmem>>, %arg9: memref<8x1xf32, #tpu.memory_space<vmem>>, %arg10: memref<3x8xf32, #tpu.memory_space<vmem>>, %arg11: memref<3x1xf32, #tpu.memory_space<vmem>>, %arg12: memref<1x3x100xf32, #tpu.memory_space<vmem>>, %arg13: memref<16x356xf32, #tpu.memory_space<vmem>>, %arg14: memref<16x356xf32, #tpu.memory_space<vmem>>) attributes {dimension_semantics = [#tpu.dimension_semantics<parallel>], iteration_bounds = array<i64: 2>, scalar_prefetch = 0 : i64, scratch_operands = 2 : i64, tpu.core_type = #tpu.core_type<tc>, window_params = [{transform_indices = @transform_0, window_bounds = array<i64: 1, 4, 8, 356>}, {transform_indices = @transform_1, window_bounds = array<i64: 1, 3, 100>}, {pipeline_mode = #tpu.pipeline_mode<synchronous>, transform_indices = @transform_2, window_bounds = array<i64: 1, 100>}, {pipeline_mode = #tpu.pipeline_mode<synchronous>, transform_indices = @transform_3, window_bounds = array<i64: 16, 128>}, {pipeline_mode = #tpu.pipeline_mode<synchronous>, transform_indices = @transform_4, window_bounds = array<i64: 16, 1>}, {pipeline_mode = #tpu.pipeline_mode<synchronous>, transform_indices = @transform_5, window_bounds = array<i64: 16, 144>}, {pipeline_mode = #tpu.pipeline_mode<synchronous>, transform_indices = @transform_6, window_bounds = array<i64: 16, 1>}, {pipeline_mode = #tpu.pipeline_mode<synchronous>, transform_indices = @transform_7, window_bounds = array<i64: 8, 144>}, {pipeline_mode = #tpu.pipeline_mode<synchronous>, transform_indices = @transform_8, window_bounds = array<i64: 8, 1>}, {pipeline_mode = #tpu.pipeline_mode<synchronous>, transform_indices = @transform_9, window_bounds = array<i64: 3, 8>}, {pipeline_mode = #tpu.pipeline_mode<synchronous>, transform_indices = @transform_10, window_bounds = array<i64: 3, 1>}, {transform_indices = @transform_11, window_bounds = array<i64: 1, 3, 100>}]} {
    %c0 = arith.constant 0 : index
    %c0_0 = arith.constant 0 : index
    %0 = vector.load %arg3[%c0, %c0_0] : memref<1x100xf32, #tpu.memory_space<vmem>>, vector<1x100xf32>
    %c0_1 = arith.constant 0 : index
    %c0_2 = arith.constant 0 : index
    %c0_3 = arith.constant 0 : index
    %c117 = arith.constant 117 : index
    %1 = vector.load %arg1[%c0_1, %c0_2, %c0_3, %c117] : memref<1x4x8x356xf32, #tpu.memory_space<vmem>>, vector<1x1x8x100xf32>
    %2 = vector.shape_cast %1 : vector<1x1x8x100xf32> to vector<8x100xf32>
    %c0_4 = arith.constant 0 : index
    %c0_5 = arith.constant 0 : index
    %c0_6 = arith.constant 0 : index
    %c118 = arith.constant 118 : index
    %3 = vector.load %arg1[%c0_4, %c0_5, %c0_6, %c118] : memref<1x4x8x356xf32, #tpu.memory_space<vmem>>, vector<1x1x8x100xf32>
    %4 = vector.shape_cast %3 : vector<1x1x8x100xf32> to vector<8x100xf32>
    %c0_7 = arith.constant 0 : index
    %c0_8 = arith.constant 0 : index
    %c0_9 = arith.constant 0 : index
    %c127 = arith.constant 127 : index
    %5 = vector.load %arg1[%c0_7, %c0_8, %c0_9, %c127] : memref<1x4x8x356xf32, #tpu.memory_space<vmem>>, vector<1x1x8x100xf32>
    %6 = vector.shape_cast %5 : vector<1x1x8x100xf32> to vector<8x100xf32>
    %c0_10 = arith.constant 0 : index
    %c0_11 = arith.constant 0 : index
    %c0_12 = arith.constant 0 : index
    %c128 = arith.constant 128 : index
    %7 = vector.load %arg1[%c0_10, %c0_11, %c0_12, %c128] : memref<1x4x8x356xf32, #tpu.memory_space<vmem>>, vector<1x1x8x100xf32>
    %8 = vector.shape_cast %7 : vector<1x1x8x100xf32> to vector<8x100xf32>
    %c0_13 = arith.constant 0 : index
    %c1 = arith.constant 1 : index
    %c0_14 = arith.constant 0 : index
    %c117_15 = arith.constant 117 : index
    %9 = vector.load %arg1[%c0_13, %c1, %c0_14, %c117_15] : memref<1x4x8x356xf32, #tpu.memory_space<vmem>>, vector<1x1x8x100xf32>
    %10 = vector.shape_cast %9 : vector<1x1x8x100xf32> to vector<8x100xf32>
    %c0_16 = arith.constant 0 : index
    %c1_17 = arith.constant 1 : index
    %c0_18 = arith.constant 0 : index
    %c118_19 = arith.constant 118 : index
    %11 = vector.load %arg1[%c0_16, %c1_17, %c0_18, %c118_19] : memref<1x4x8x356xf32, #tpu.memory_space<vmem>>, vector<1x1x8x100xf32>
    %12 = vector.shape_cast %11 : vector<1x1x8x100xf32> to vector<8x100xf32>
    %c0_20 = arith.constant 0 : index
    %c1_21 = arith.constant 1 : index
    %c0_22 = arith.constant 0 : index
    %c127_23 = arith.constant 127 : index
    %13 = vector.load %arg1[%c0_20, %c1_21, %c0_22, %c127_23] : memref<1x4x8x356xf32, #tpu.memory_space<vmem>>, vector<1x1x8x100xf32>
    %14 = vector.shape_cast %13 : vector<1x1x8x100xf32> to vector<8x100xf32>
    %c0_24 = arith.constant 0 : index
    %c1_25 = arith.constant 1 : index
    %c0_26 = arith.constant 0 : index
    %c128_27 = arith.constant 128 : index
    %15 = vector.load %arg1[%c0_24, %c1_25, %c0_26, %c128_27] : memref<1x4x8x356xf32, #tpu.memory_space<vmem>>, vector<1x1x8x100xf32>
    %16 = vector.shape_cast %15 : vector<1x1x8x100xf32> to vector<8x100xf32>
    %c0_28 = arith.constant 0 : index
    %c2 = arith.constant 2 : index
    %c0_29 = arith.constant 0 : index
    %c117_30 = arith.constant 117 : index
    %17 = vector.load %arg1[%c0_28, %c2, %c0_29, %c117_30] : memref<1x4x8x356xf32, #tpu.memory_space<vmem>>, vector<1x1x8x100xf32>
    %18 = vector.shape_cast %17 : vector<1x1x8x100xf32> to vector<8x100xf32>
    %c0_31 = arith.constant 0 : index
    %c2_32 = arith.constant 2 : index
    %c0_33 = arith.constant 0 : index
    %c118_34 = arith.constant 118 : index
    %19 = vector.load %arg1[%c0_31, %c2_32, %c0_33, %c118_34] : memref<1x4x8x356xf32, #tpu.memory_space<vmem>>, vector<1x1x8x100xf32>
    %20 = vector.shape_cast %19 : vector<1x1x8x100xf32> to vector<8x100xf32>
    %c0_35 = arith.constant 0 : index
    %c2_36 = arith.constant 2 : index
    %c0_37 = arith.constant 0 : index
    %c127_38 = arith.constant 127 : index
    %21 = vector.load %arg1[%c0_35, %c2_36, %c0_37, %c127_38] : memref<1x4x8x356xf32, #tpu.memory_space<vmem>>, vector<1x1x8x100xf32>
    %22 = vector.shape_cast %21 : vector<1x1x8x100xf32> to vector<8x100xf32>
    %c0_39 = arith.constant 0 : index
    %c2_40 = arith.constant 2 : index
    %c0_41 = arith.constant 0 : index
    %c128_42 = arith.constant 128 : index
    %23 = vector.load %arg1[%c0_39, %c2_40, %c0_41, %c128_42] : memref<1x4x8x356xf32, #tpu.memory_space<vmem>>, vector<1x1x8x100xf32>
    %24 = vector.shape_cast %23 : vector<1x1x8x100xf32> to vector<8x100xf32>
    %c0_43 = arith.constant 0 : index
    %c3 = arith.constant 3 : index
    %c0_44 = arith.constant 0 : index
    %c117_45 = arith.constant 117 : index
    %25 = vector.load %arg1[%c0_43, %c3, %c0_44, %c117_45] : memref<1x4x8x356xf32, #tpu.memory_space<vmem>>, vector<1x1x8x100xf32>
    %26 = vector.shape_cast %25 : vector<1x1x8x100xf32> to vector<8x100xf32>
    %c0_46 = arith.constant 0 : index
    %c3_47 = arith.constant 3 : index
    %c0_48 = arith.constant 0 : index
    %c118_49 = arith.constant 118 : index
    %27 = vector.load %arg1[%c0_46, %c3_47, %c0_48, %c118_49] : memref<1x4x8x356xf32, #tpu.memory_space<vmem>>, vector<1x1x8x100xf32>
    %28 = vector.shape_cast %27 : vector<1x1x8x100xf32> to vector<8x100xf32>
    %c0_50 = arith.constant 0 : index
    %c3_51 = arith.constant 3 : index
    %c0_52 = arith.constant 0 : index
    %c127_53 = arith.constant 127 : index
    %29 = vector.load %arg1[%c0_50, %c3_51, %c0_52, %c127_53] : memref<1x4x8x356xf32, #tpu.memory_space<vmem>>, vector<1x1x8x100xf32>
    %30 = vector.shape_cast %29 : vector<1x1x8x100xf32> to vector<8x100xf32>
    %c0_54 = arith.constant 0 : index
    %c3_55 = arith.constant 3 : index
    %c0_56 = arith.constant 0 : index
    %c128_57 = arith.constant 128 : index
    %31 = vector.load %arg1[%c0_54, %c3_55, %c0_56, %c128_57] : memref<1x4x8x356xf32, #tpu.memory_space<vmem>>, vector<1x1x8x100xf32>
    %32 = vector.shape_cast %31 : vector<1x1x8x100xf32> to vector<8x100xf32>
    %33 = tpu.concatenate %2, %4, %6, %8, %10, %12, %14, %16, %18, %20, %22, %24, %26, %28, %30, %32 in 0 : vector<8x100xf32>, vector<8x100xf32>, vector<8x100xf32>, vector<8x100xf32>, vector<8x100xf32>, vector<8x100xf32>, vector<8x100xf32>, vector<8x100xf32>, vector<8x100xf32>, vector<8x100xf32>, vector<8x100xf32>, vector<8x100xf32>, vector<8x100xf32>, vector<8x100xf32>, vector<8x100xf32>, vector<8x100xf32> -> vector<128x100xf32>
    %c0_58 = arith.constant 0 : index
    %c0_59 = arith.constant 0 : index
    %34 = vector.load %arg4[%c0_58, %c0_59] : memref<16x128xf32, #tpu.memory_space<vmem>>, vector<16x128xf32>
    %cst = arith.constant dense<0.000000e+00> : vector<16x100xf32>
    %35 = tpu.matmul %34, %33, %cst {dimension_numbers = #tpu.dot_dimension_numbers<[1], [0], [0], [1], [0, 0, 1, 1], [], []>} : vector<16x128xf32>, vector<128x100xf32>, vector<16x100xf32> -> vector<16x100xf32>
    %c0_60 = arith.constant 0 : index
    %c0_61 = arith.constant 0 : index
    %36 = vector.load %arg5[%c0_60, %c0_61] : memref<16x1xf32, #tpu.memory_space<vmem>>, vector<16x1xf32>
    %37 = vector.broadcast %36 : vector<16x1xf32> to vector<16x100xf32>
    %38 = arith.addf %35, %37 : vector<16x100xf32>
    %cst_62 = arith.constant 0.000000e+00 : f32
    %39 = vector.broadcast %cst_62 : f32 to vector<16x100xf32>
    %40 = arith.cmpf oge, %38, %39 : vector<16x100xf32>
    %cst_63 = arith.constant 1.000000e-01 : f32
    %41 = vector.broadcast %cst_63 : f32 to vector<16x100xf32>
    %42 = arith.mulf %41, %38 : vector<16x100xf32>
    %43 = arith.select %40, %38, %42 : vector<16x100xi1>, vector<16x100xf32>
    %44 = vector.broadcast %0 : vector<1x100xf32> to vector<16x100xf32>
    %45 = arith.mulf %43, %44 : vector<16x100xf32>
    %cst_64 = arith.constant 0.000000e+00 : f32
    %46 = vector.broadcast %cst_64 : f32 to vector<16x356xf32>
    %c0_65 = arith.constant 0 : index
    %c0_66 = arith.constant 0 : index
    %47 = vector.load %arg13[%c0_65, %c0_66] : memref<16x356xf32, #tpu.memory_space<vmem>>, vector<16x356xf32>
    tpu.vector_store %arg13[%c0_65, %c0_66], %46 {strides = array<i32>} : memref<16x356xf32, #tpu.memory_space<vmem>>, vector<16x356xf32>,
    %c0_67 = arith.constant 0 : index
    %c128_68 = arith.constant 128 : index
    %48 = vector.load %arg13[%c0_67, %c128_68] : memref<16x356xf32, #tpu.memory_space<vmem>>, vector<16x100xf32>
    tpu.vector_store %arg13[%c0_67, %c128_68], %45 {strides = array<i32>} : memref<16x356xf32, #tpu.memory_space<vmem>>, vector<16x100xf32>,
    %c0_69 = arith.constant 0 : index
    %c117_70 = arith.constant 117 : index
    %49 = vector.load %arg13[%c0_69, %c117_70] : memref<16x356xf32, #tpu.memory_space<vmem>>, vector<16x100xf32>
    %c0_71 = arith.constant 0 : index
    %c118_72 = arith.constant 118 : index
    %50 = vector.load %arg13[%c0_71, %c118_72] : memref<16x356xf32, #tpu.memory_space<vmem>>, vector<16x100xf32>
    %c0_73 = arith.constant 0 : index
    %c119 = arith.constant 119 : index
    %51 = vector.load %arg13[%c0_73, %c119] : memref<16x356xf32, #tpu.memory_space<vmem>>, vector<16x100xf32>
    %c0_74 = arith.constant 0 : index
    %c127_75 = arith.constant 127 : index
    %52 = vector.load %arg13[%c0_74, %c127_75] : memref<16x356xf32, #tpu.memory_space<vmem>>, vector<16x100xf32>
    %c0_76 = arith.constant 0 : index
    %c128_77 = arith.constant 128 : index
    %53 = vector.load %arg13[%c0_76, %c128_77] : memref<16x356xf32, #tpu.memory_space<vmem>>, vector<16x100xf32>
    %c0_78 = arith.constant 0 : index
    %c129 = arith.constant 129 : index
    %54 = vector.load %arg13[%c0_78, %c129] : memref<16x356xf32, #tpu.memory_space<vmem>>, vector<16x100xf32>
    %c0_79 = arith.constant 0 : index
    %c137 = arith.constant 137 : index
    %55 = vector.load %arg13[%c0_79, %c137] : memref<16x356xf32, #tpu.memory_space<vmem>>, vector<16x100xf32>
    %c0_80 = arith.constant 0 : index
    %c138 = arith.constant 138 : index
    %56 = vector.load %arg13[%c0_80, %c138] : memref<16x356xf32, #tpu.memory_space<vmem>>, vector<16x100xf32>
    %c0_81 = arith.constant 0 : index
    %c139 = arith.constant 139 : index
    %57 = vector.load %arg13[%c0_81, %c139] : memref<16x356xf32, #tpu.memory_space<vmem>>, vector<16x100xf32>
    %58 = tpu.concatenate %49, %50, %51, %52, %53, %54, %55, %56, %57 in 0 : vector<16x100xf32>, vector<16x100xf32>, vector<16x100xf32>, vector<16x100xf32>, vector<16x100xf32>, vector<16x100xf32>, vector<16x100xf32>, vector<16x100xf32>, vector<16x100xf32> -> vector<144x100xf32>
    %c0_82 = arith.constant 0 : index
    %c0_83 = arith.constant 0 : index
    %59 = vector.load %arg6[%c0_82, %c0_83] : memref<16x144xf32, #tpu.memory_space<vmem>>, vector<16x144xf32>
    %cst_84 = arith.constant dense<0.000000e+00> : vector<16x100xf32>
    %60 = tpu.matmul %59, %58, %cst_84 {dimension_numbers = #tpu.dot_dimension_numbers<[1], [0], [0], [1], [0, 0, 1, 1], [], []>} : vector<16x144xf32>, vector<144x100xf32>, vector<16x100xf32> -> vector<16x100xf32>
    %c0_85 = arith.constant 0 : index
    %c0_86 = arith.constant 0 : index
    %61 = vector.load %arg7[%c0_85, %c0_86] : memref<16x1xf32, #tpu.memory_space<vmem>>, vector<16x1xf32>
    %62 = vector.broadcast %61 : vector<16x1xf32> to vector<16x100xf32>
    %63 = arith.addf %60, %62 : vector<16x100xf32>
    %cst_87 = arith.constant 0.000000e+00 : f32
    %64 = vector.broadcast %cst_87 : f32 to vector<16x100xf32>
    %65 = arith.cmpf oge, %63, %64 : vector<16x100xf32>
    %cst_88 = arith.constant 1.000000e-01 : f32
    %66 = vector.broadcast %cst_88 : f32 to vector<16x100xf32>
    %67 = arith.mulf %66, %63 : vector<16x100xf32>
    %68 = arith.select %65, %63, %67 : vector<16x100xi1>, vector<16x100xf32>
    %69 = vector.broadcast %0 : vector<1x100xf32> to vector<16x100xf32>
    %70 = arith.mulf %68, %69 : vector<16x100xf32>
    %cst_89 = arith.constant 0.000000e+00 : f32
    %71 = vector.broadcast %cst_89 : f32 to vector<16x356xf32>
    %c0_90 = arith.constant 0 : index
    %c0_91 = arith.constant 0 : index
    %72 = vector.load %arg14[%c0_90, %c0_91] : memref<16x356xf32, #tpu.memory_space<vmem>>, vector<16x356xf32>
    tpu.vector_store %arg14[%c0_90, %c0_91], %71 {strides = array<i32>} : memref<16x356xf32, #tpu.memory_space<vmem>>, vector<16x356xf32>,
    %c0_92 = arith.constant 0 : index
    %c128_93 = arith.constant 128 : index
    %73 = vector.load %arg14[%c0_92, %c128_93] : memref<16x356xf32, #tpu.memory_space<vmem>>, vector<16x100xf32>
    tpu.vector_store %arg14[%c0_92, %c128_93], %70 {strides = array<i32>} : memref<16x356xf32, #tpu.memory_space<vmem>>, vector<16x100xf32>,
    %c0_94 = arith.constant 0 : index
    %c117_95 = arith.constant 117 : index
    %74 = vector.load %arg14[%c0_94, %c117_95] : memref<16x356xf32, #tpu.memory_space<vmem>>, vector<16x100xf32>
    %c0_96 = arith.constant 0 : index
    %c118_97 = arith.constant 118 : index
    %75 = vector.load %arg14[%c0_96, %c118_97] : memref<16x356xf32, #tpu.memory_space<vmem>>, vector<16x100xf32>
    %c0_98 = arith.constant 0 : index
    %c119_99 = arith.constant 119 : index
    %76 = vector.load %arg14[%c0_98, %c119_99] : memref<16x356xf32, #tpu.memory_space<vmem>>, vector<16x100xf32>
    %c0_100 = arith.constant 0 : index
    %c127_101 = arith.constant 127 : index
    %77 = vector.load %arg14[%c0_100, %c127_101] : memref<16x356xf32, #tpu.memory_space<vmem>>, vector<16x100xf32>
    %c0_102 = arith.constant 0 : index
    %c128_103 = arith.constant 128 : index
    %78 = vector.load %arg14[%c0_102, %c128_103] : memref<16x356xf32, #tpu.memory_space<vmem>>, vector<16x100xf32>
    %c0_104 = arith.constant 0 : index
    %c129_105 = arith.constant 129 : index
    %79 = vector.load %arg14[%c0_104, %c129_105] : memref<16x356xf32, #tpu.memory_space<vmem>>, vector<16x100xf32>
    %c0_106 = arith.constant 0 : index
    %c137_107 = arith.constant 137 : index
    %80 = vector.load %arg14[%c0_106, %c137_107] : memref<16x356xf32, #tpu.memory_space<vmem>>, vector<16x100xf32>
    %c0_108 = arith.constant 0 : index
    %c138_109 = arith.constant 138 : index
    %81 = vector.load %arg14[%c0_108, %c138_109] : memref<16x356xf32, #tpu.memory_space<vmem>>, vector<16x100xf32>
    %c0_110 = arith.constant 0 : index
    %c139_111 = arith.constant 139 : index
    %82 = vector.load %arg14[%c0_110, %c139_111] : memref<16x356xf32, #tpu.memory_space<vmem>>, vector<16x100xf32>
    %83 = tpu.concatenate %74, %75, %76, %77, %78, %79, %80, %81, %82 in 0 : vector<16x100xf32>, vector<16x100xf32>, vector<16x100xf32>, vector<16x100xf32>, vector<16x100xf32>, vector<16x100xf32>, vector<16x100xf32>, vector<16x100xf32>, vector<16x100xf32> -> vector<144x100xf32>
    %c0_112 = arith.constant 0 : index
    %c0_113 = arith.constant 0 : index
    %84 = vector.load %arg8[%c0_112, %c0_113] : memref<8x144xf32, #tpu.memory_space<vmem>>, vector<8x144xf32>
    %cst_114 = arith.constant dense<0.000000e+00> : vector<8x100xf32>
    %85 = tpu.matmul %84, %83, %cst_114 {dimension_numbers = #tpu.dot_dimension_numbers<[1], [0], [0], [1], [0, 0, 1, 1], [], []>} : vector<8x144xf32>, vector<144x100xf32>, vector<8x100xf32> -> vector<8x100xf32>
    %c0_115 = arith.constant 0 : index
    %c0_116 = arith.constant 0 : index
    %86 = vector.load %arg9[%c0_115, %c0_116] : memref<8x1xf32, #tpu.memory_space<vmem>>, vector<8x1xf32>
    %87 = vector.broadcast %86 : vector<8x1xf32> to vector<8x100xf32>
    %88 = arith.addf %85, %87 : vector<8x100xf32>
    %cst_117 = arith.constant 0.000000e+00 : f32
    %89 = vector.broadcast %cst_117 : f32 to vector<8x100xf32>
    %90 = arith.cmpf oge, %88, %89 : vector<8x100xf32>
    %cst_118 = arith.constant 1.000000e-01 : f32
    %91 = vector.broadcast %cst_118 : f32 to vector<8x100xf32>
    %92 = arith.mulf %91, %88 : vector<8x100xf32>
    %93 = arith.select %90, %88, %92 : vector<8x100xi1>, vector<8x100xf32>
    %94 = vector.broadcast %0 : vector<1x100xf32> to vector<8x100xf32>
    %95 = arith.mulf %93, %94 : vector<8x100xf32>
    %c0_119 = arith.constant 0 : index
    %c0_120 = arith.constant 0 : index
    %96 = vector.load %arg10[%c0_119, %c0_120] : memref<3x8xf32, #tpu.memory_space<vmem>>, vector<3x8xf32>
    %cst_121 = arith.constant dense<0.000000e+00> : vector<3x100xf32>
    %97 = tpu.matmul %96, %95, %cst_121 {dimension_numbers = #tpu.dot_dimension_numbers<[1], [0], [0], [1], [0, 0, 1, 1], [], []>} : vector<3x8xf32>, vector<8x100xf32>, vector<3x100xf32> -> vector<3x100xf32>
    %c0_122 = arith.constant 0 : index
    %c0_123 = arith.constant 0 : index
    %98 = vector.load %arg11[%c0_122, %c0_123] : memref<3x1xf32, #tpu.memory_space<vmem>>, vector<3x1xf32>
    %99 = vector.broadcast %98 : vector<3x1xf32> to vector<3x100xf32>
    %100 = arith.addf %97, %99 : vector<3x100xf32>
    %c0_124 = arith.constant 0 : index
    %c0_125 = arith.constant 0 : index
    %c0_126 = arith.constant 0 : index
    %101 = vector.load %arg2[%c0_124, %c0_125, %c0_126] : memref<1x3x100xf32, #tpu.memory_space<vmem>>, vector<1x3x100xf32>
    %102 = vector.shape_cast %101 : vector<1x3x100xf32> to vector<3x100xf32>
    %103 = arith.addf %100, %102 : vector<3x100xf32>
    %c0_127 = arith.constant 0 : index
    %c0_128 = arith.constant 0 : index
    %c0_129 = arith.constant 0 : index
    %104 = vector.load %arg12[%c0_127, %c0_128, %c0_129] : memref<1x3x100xf32, #tpu.memory_space<vmem>>, vector<1x3x100xf32>
    %105 = vector.shape_cast %104 : vector<1x3x100xf32> to vector<3x100xf32>
    %106 = vector.shape_cast %103 : vector<3x100xf32> to vector<1x3x100xf32>
    tpu.vector_store %arg12[%c0_127, %c0_128, %c0_129], %106 {strides = array<i32>} : memref<1x3x100xf32, #tpu.memory_space<vmem>>, vector<1x3x100xf32>,
    return
  }
  func.func @transform_0(%arg0: i32) -> (i32, i32, i32, i32) {
    %c0_i32 = arith.constant 0 : i32
    %c0_i32_0 = arith.constant 0 : i32
    %c0_i32_1 = arith.constant 0 : i32
    %c0_i32_2 = arith.constant 0 : i32
    return %arg0, %c0_i32, %c0_i32_0, %c0_i32_1 : i32, i32, i32, i32
  }
  func.func @transform_1(%arg0: i32) -> (i32, i32, i32) {
    %c0_i32 = arith.constant 0 : i32
    %c0_i32_0 = arith.constant 0 : i32
    %c0_i32_1 = arith.constant 0 : i32
    return %arg0, %c0_i32, %c0_i32_0 : i32, i32, i32
  }
  func.func @transform_2(%arg0: i32) -> (i32, i32) {
    %c0_i32 = arith.constant 0 : i32
    %c0_i32_0 = arith.constant 0 : i32
    %c0_i32_1 = arith.constant 0 : i32
    return %c0_i32, %c0_i32_0 : i32, i32
  }
  func.func @transform_3(%arg0: i32) -> (i32, i32) {
    %c0_i32 = arith.constant 0 : i32
    %c0_i32_0 = arith.constant 0 : i32
    %c0_i32_1 = arith.constant 0 : i32
    return %c0_i32, %c0_i32_0 : i32, i32
  }
  func.func @transform_4(%arg0: i32) -> (i32, i32) {
    %c0_i32 = arith.constant 0 : i32
    %c0_i32_0 = arith.constant 0 : i32
    %c0_i32_1 = arith.constant 0 : i32
    return %c0_i32, %c0_i32_0 : i32, i32
  }
  func.func @transform_5(%arg0: i32) -> (i32, i32) {
    %c0_i32 = arith.constant 0 : i32
    %c0_i32_0 = arith.constant 0 : i32
    %c0_i32_1 = arith.constant 0 : i32
    return %c0_i32, %c0_i32_0 : i32, i32
  }
  func.func @transform_6(%arg0: i32) -> (i32, i32) {
    %c0_i32 = arith.constant 0 : i32
    %c0_i32_0 = arith.constant 0 : i32
    %c0_i32_1 = arith.constant 0 : i32
    return %c0_i32, %c0_i32_0 : i32, i32
  }
  func.func @transform_7(%arg0: i32) -> (i32, i32) {
    %c0_i32 = arith.constant 0 : i32
    %c0_i32_0 = arith.constant 0 : i32
    %c0_i32_1 = arith.constant 0 : i32
    return %c0_i32, %c0_i32_0 : i32, i32
  }
  func.func @transform_8(%arg0: i32) -> (i32, i32) {
    %c0_i32 = arith.constant 0 : i32
    %c0_i32_0 = arith.constant 0 : i32
    %c0_i32_1 = arith.constant 0 : i32
    return %c0_i32, %c0_i32_0 : i32, i32
  }
  func.func @transform_9(%arg0: i32) -> (i32, i32) {
    %c0_i32 = arith.constant 0 : i32
    %c0_i32_0 = arith.constant 0 : i32
    %c0_i32_1 = arith.constant 0 : i32
    return %c0_i32, %c0_i32_0 : i32, i32
  }
  func.func @transform_10(%arg0: i32) -> (i32, i32) {
    %c0_i32 = arith.constant 0 : i32
    %c0_i32_0 = arith.constant 0 : i32
    %c0_i32_1 = arith.constant 0 : i32
    return %c0_i32, %c0_i32_0 : i32, i32
  }
  func.func @transform_11(%arg0: i32) -> (i32, i32, i32) {
    %c0_i32 = arith.constant 0 : i32
    %c0_i32_0 = arith.constant 0 : i32
    %c0_i32_1 = arith.constant 0 : i32
    return %arg0, %c0_i32, %c0_i32_0 : i32, i32, i32
  }
}

</mosaic_0001>

<bundles_post_ra>
// kernel: direct_kernel_estimator.2
= control target key start
LH: loop header
LB: loop body
LE: loop exit
PB: predicated region body
PF: predicated region fallthrough
CT: control target
= control target key end

     0   :  { %s2192_s27 = smov 0   ;;  %s2625_s0 = inlined_call_operand.vmem [shape: f32[2,8,580], index: 0, kind: input, shape index: {}]   ;;  %s2626_s1 = inlined_call_operand.vmem [shape: f32[1,324], index: 1, kind: input, shape index: {}]   ;;  %s2627_s2 = inlined_call_operand.vmem [shape: f32[8,72], index: 2, kind: input, shape index: {}]   ;;  %s2628_s3 = inlined_call_operand.vmem [shape: f32[8,1], index: 3, kind: input, shape index: {}]   ;;  %s2629_s4 = inlined_call_operand.vmem [shape: f32[8,72], index: 4, kind: input, shape index: {}]   ;;  %s2630_s5 = inlined_call_operand.vmem [shape: f32[8,1], index: 5, kind: input, shape index: {}]   ;;  %s2631_s6 = inlined_call_operand.vmem [shape: f32[8,72], index: 6, kind: input, shape index: {}]   ;;  %s2632_s7 = inlined_call_operand.vmem [shape: f32[8,1], index: 7, kind: input, shape index: {}]   ;;  %s2633_s8 = inlined_call_operand.vmem [shape: f32[2,8,324], index: 8, kind: output, shape index: {}]  }
   0x1 LB: > { %s1518_s28 = sadd.s32 4294967295, %s2132_s27   ;;  %p1522_p0 = scmp.ge.s32.totalorder %s2132_s27, 1  ;;  %s2132_s27 = sphi %s2192_s27, %s18_s27  }
   0x2   : > { %p262_p1 = scmp.lt.s32.totalorder %s2132_s27, 3 }
   0x4   : > { %p263_p2 = pnand %p1522_p0, %p262_p1 }
   0x5   : > { %p296_p3 = scmp.lt.s32.totalorder (!%p263_p2), %s1518_s28, 1  ;;  %s2134_s11 = smov (!%p263_p2), 126   ;;  %v2143_v27 = vmov (!%p263_p2), 0.0|0.0   ;;  %vm323_vm0 = vcmask (!%p263_p2), 1039360   ;;  %vm347_vm1 = vcmask (!%p263_p2), 900096   ;;  %vm335_vm2 = vcmask (!%p263_p2), 1031168  }
   0x6   : > { %266 = sbr.rel (%p263_p2) target bundleno = 1556 (0x614), region = 52  ;;  %s2135_s12 = smov (!%p263_p2), 127   ;;  %1642 = vmatprep.subr.bf16.mxu1 (!%p263_p2), %v2143_v27  ;;  %vm366_vm3 = vcmask (!%p263_p2), 883712   ;;  %vm384_vm4 = vcmask (!%p263_p2), 744448   ;;  %vm357_vm5 = vcmask (!%p263_p2), 891904   ;;  %vm375_vm6 = vcmask (!%p263_p2), 752640  }
   0x7   : > { %s2136_s13 = smov (!%p263_p2), 110   ;;  %s2137_s14 = smov (!%p263_p2), 109   ;;  %vm393_vm7 = vcmask (!%p263_p2), 736256   ;;  %vm2145_vm8 = vmmov (!%p263_p2), 0   ;;  %vm475_vm9 = vcmask (!%p263_p2), 154624   ;;  %vm530_vm10 = vcmask (!%p263_p2), 588800  }
   0x8   : > { %s2138_s15 = smov (!%p263_p2), 108   ;;  %s2139_s16 = smov (!%p263_p2), 92   ;;  %vm707_vm11 = vcmask (!%p263_p2), 556032  }
   0x9   : > { %s2140_s17 = smov (!%p263_p2), 91   ;;  %s2141_s18 = smov (!%p263_p2), 90  }
   0xa   : > { %s2142_s19 = smov (!%p263_p2), 19  }
   0xd   : > { %s2635_s28 = smov (!%p296_p3, %s1518_s28), 1 }
   0xe   : > { %s1710_s29 = smul.u32 40, %s2635_s28 }
  0x10   : > { %s300_s10 = scalar_lea.vmem %s2625_s0, %s1710_s29 }
  0x11   : > { %v308_v0 = vld [vmem:[%s300_s10 + $0x8] sm:$0xff]  ;;  %v309_v1 = vld [vmem:[%s300_s10 + $0x10] sm:$0xff]  ;;  %v2206_v2 = vld [vmem:[%s300_s10] sm:$0xff] }
  0x12   : > { %v1743_v3 = vpack.i.bf16 %v309_v1, %v308_v0  ;;  %v310_v4 = vld [vmem:[%s300_s10 + $0x18] sm:$0xff] }
  0x13   : > { %v1748_v5 = vpack.i.bf16 %v2206_v2, %v310_v4 }
  0x14   : > { %1744 = vrot.lane.b32.xlu1 %v1743_v3, %s2134_s11  ;;  %1734 = vrot.lane.b32.xlu0 %v1743_v3, %s2135_s12 }
  0x18   : > { %1749 = vrot.lane.b32.xlu1 %v1748_v5, %s2134_s11  ;;  %1739 = vrot.lane.b32.xlu0 %v1748_v5, %s2135_s12 }
  0x1c   : > { %1759 = vrot.lane.b32.xlu1 %v1748_v5, %s2136_s13  ;;  %1754 = vrot.lane.b32.xlu0 %v1743_v3, %s2136_s13 }
  0x20   : > { %355 = vrot.lane.b32.xlu1 %v310_v4, %s2137_s14  ;;  %1764 = vrot.lane.b32.xlu0 %v1743_v3, %s2137_s14 }
  0x24   : > { %364 = vrot.lane.b32.xlu1 %v310_v4, %s2138_s15  ;;  %1769 = vrot.lane.b32.xlu0 %v1743_v3, %s2138_s15 }
  0x28   : > { %373 = vrot.lane.b32.xlu1 %v310_v4, %s2139_s16  ;;  %1774 = vrot.lane.b32.xlu0 %v1743_v3, %s2139_s16 }
  0x2c   : > { %382 = vrot.lane.b32.xlu1 %v310_v4, %s2140_s17  ;;  %1779 = vrot.lane.b32.xlu0 %v1743_v3, %s2140_s17 }
  0x30   : > { %387 = vrot.lane.b32.xlu0 %v308_v0, %s2141_s18  ;;  %389 = vrot.lane.b32.xlu1 %v309_v1, %s2141_s18 }
  0x34   : > { %391 = vrot.lane.b32.xlu0 %v310_v4, %s2141_s18  ;;  %1784 = vrot.lane.b32.xlu1 %v1743_v3, %s2142_s19 }
  0x86   : > { %v2227_v6 = vpop.permute.xlu1 %1744  ;;  %v1735_v7 = vpop.permute.xlu0 %1734 }
  0x87   : > { %v1737_v28 = vunpack.i.h.bf16 %v1735_v7  ;;  %v1736_v29 = vunpack.i.l.bf16 %v1735_v7  ;;  %v1747_v40 = vunpack.i.h.bf16 %v2227_v6  ;;  %v1746_v41 = vunpack.i.l.bf16 %v2227_v6 }
  0x89   : > { %v325_v42 = vsel %vm323_vm0, %v1736_v29, %v1737_v28  ;;  %v337_v50 = vsel %vm335_vm2, %v1746_v41, %v1747_v40 }
  0x8a   : > { %v2229_v8 = vpop.permute.xlu1 %1749  ;;  %v1740_v9 = vpop.permute.xlu0 %1739 }
  0x8b   : > { %v1741_v10 = vunpack.i.l.bf16 %v1740_v9  ;;  %v1751_v14 = vunpack.i.l.bf16 %v2229_v8  ;;  %v1742_v30 = vunpack.i.h.bf16 %v1740_v9  ;;  %v1752_v53 = vunpack.i.h.bf16 %v2229_v8 }
  0x8d   : > { %v1788_v11 = vpack.i.bf16 %v1741_v10, %v310_v4  ;;  %v326_v38 = vsel %vm323_vm0, %v1737_v28, %v1741_v10  ;;  %v324_v43 = vsel %vm323_vm0, %v1742_v30, %v1736_v29  ;;  %v338_v51 = vsel %vm335_vm2, %v1747_v40, %v1751_v14 }
  0x8e   : > { %v2231_v12 = vpop.permute.xlu1 %1759  ;;  %v2233_v13 = vpop.permute.xlu0 %1754  ;;  %v1818_v44 = vpack.i.bf16 %v326_v38, %v325_v42  ;;  %v1823_v48 = vpack.i.bf16 %v324_v43, %v2206_v2  ;;  %v1828_v57 = vpack.i.bf16 %v338_v51, %v337_v50  ;;  %v336_v62 = vsel %vm335_vm2, %v1752_v53, %v1746_v41 }
  0x8f   : > { %v1761_v15 = vunpack.i.l.bf16 %v2231_v12  ;;  %1789 = vrot.lane.b32.xlu0 %v1788_v11, %s2142_s19  ;;  %v1757_v36 = vunpack.i.h.bf16 %v2233_v13  ;;  %v1756_v37 = vunpack.i.l.bf16 %v2233_v13  ;;  %v1762_v49 = vunpack.i.h.bf16 %v2231_v12 }
  0x90   : > { %v2144_v12 = vmov 0.0  }
  0x91   : > { %v1793_v16 = vpack.i.bf16 %v1761_v15, %v1751_v14  ;;  %v349_v46 = vsel %vm347_vm1, %v1756_v37, %v1757_v36  ;;  %v350_v47 = vsel %vm347_vm1, %v1757_v36, %v1761_v15  ;;  %v348_v60 = vsel %vm347_vm1, %v1762_v49, %v1756_v37  ;;  %703 = vst [vmem:[#allocation2] sm:$0xff] %v2144_v12 }
  0x92   : > { %v2238_v17 = vpop.permute.xlu1 %355  ;;  %v2240_v18 = vpop.permute.xlu0 %1764  ;;  %v1833_v52 = vpack.i.bf16 %v350_v47, %v349_v46  ;;  %v1838_v1 = vpack.i.bf16 %v348_v60, %v336_v62  ;;  %706 = vst [vmem:[#allocation2 + $0x18] sm:$0xff] %v2144_v12  ;;  %1085 = vst [vmem:[#allocation3 + $0x18] sm:$0xff] %v2144_v12  ;;  %598 = vmatprep.mubr.f32.mxu0 %v2144_v12  ;;  %1581 = vmatprep.mubr.msk.f32.mxu1 %vm2145_vm8, %v2144_v12  ;;  %v2146_v14 = vmov 0  }
  0x93   : > { %1794 = vrot.lane.b32.xlu0 %v1793_v16, %s2142_s19  ;;  %v1766_v21 = vunpack.i.l.bf16 %v2240_v18  ;;  %v1767_v59 = vunpack.i.h.bf16 %v2240_v18  ;;  %1863 = vset.pattern.permute.xlu1 %v2146_v14  ;;  %v397_v16 = vld [vmem:[%s2628_s3] sm:$0xff] }
  0x94   : > { %2124 = vset.pattern.permute.xlu0 %v2146_v14 }
  0x95   : > { %v358_v3 = vsel %vm357_vm5, %v1766_v21, %v1767_v59  ;;  %v359_v4 = vsel %vm357_vm5, %v1767_v59, %v2238_v17 }
  0x96   : > { %v365_v19 = vpop.permute.xlu1 %364  ;;  %v1770_v20 = vpop.permute.xlu0 %1769  ;;  %v1843_v8 = vpack.i.bf16 %v359_v4, %v358_v3 }
  0x97   : > { %v1803_v22 = vpack.i.bf16 %v365_v19, %v2238_v17  ;;  %v1771_v23 = vunpack.i.l.bf16 %v1770_v20  ;;  %v1772_v45 = vunpack.i.h.bf16 %v1770_v20 }
  0x99   : > { %v1798_v24 = vpack.i.bf16 %v1771_v23, %v1766_v21  ;;  %1804 = vrot.lane.b32.xlu0 %v1803_v22, %s2142_s19  ;;  %v367_v55 = vsel %vm366_vm3, %v1771_v23, %v1772_v45  ;;  %v368_v56 = vsel %vm366_vm3, %v1772_v45, %v365_v19 }
  0x9a   : > { %v2248_v25 = vpop.permute.xlu1 %373  ;;  %v2250_v26 = vpop.permute.xlu0 %1774  ;;  %v1848_v61 = vpack.i.bf16 %v368_v56, %v367_v55 }
  0x9b   : > { %1799 = vrot.lane.b32.xlu1 %v1798_v24, %s2142_s19  ;;  %v1776_v33 = vunpack.i.l.bf16 %v2250_v26  ;;  %v1777_v2 = vunpack.i.h.bf16 %v2250_v26 }
  0x9d   : > { %v376_v9 = vsel %vm375_vm6, %v1776_v33, %v1777_v2  ;;  %v377_v10 = vsel %vm375_vm6, %v1777_v2, %v2248_v25 }
  0x9e   : > { %v383_v31 = vpop.permute.xlu1 %382  ;;  %v1780_v32 = vpop.permute.xlu0 %1779  ;;  %v1853_v13 = vpack.i.bf16 %v377_v10, %v376_v9 }
  0x9f   : > { %v1813_v34 = vpack.i.bf16 %v383_v31, %v2248_v25  ;;  %v1781_v35 = vunpack.i.l.bf16 %v1780_v32  ;;  %v1782_v54 = vunpack.i.h.bf16 %v1780_v32 }
  0xa1   : > { %1814 = vrot.lane.b32.xlu0 %v1813_v34, %s2142_s19  ;;  %v1808_v39 = vpack.i.bf16 %v1781_v35, %v1776_v33  ;;  %v385_v63 = vsel %vm384_vm4, %v1781_v35, %v1782_v54  ;;  %v386_v0 = vsel %vm384_vm4, %v1782_v54, %v383_v31 }
  0xa2   : > { %v388_v58 = vpop.permute.xlu0 %387  ;;  %v1858_v5 = vpack.i.bf16 %v386_v0, %v385_v63  ;;  %v390_v6 = vpop.permute.xlu1 %389 }
  0xa3   : > { %1809 = vrot.lane.b32.xlu1 %v1808_v39, %s2142_s19  ;;  %v394_v15 = vsel %vm393_vm7, %v388_v58, %v390_v6 }
  0xa5   : > { %1819 = vrot.lane.b32.xlu0 %v1818_v44, %s2142_s19 }
  0xa6   : > { %v392_v7 = vpop.permute.xlu0 %391  ;;  %v1785_v19 = vpop.permute.xlu1 %1784 }
  0xa7   : > { %1824 = vrot.lane.b32.xlu1 %v1823_v48, %s2142_s19  ;;  %v395_v11 = vsel %vm393_vm7, %v390_v6, %v392_v7  ;;  %v1787_v23 = vunpack.i.h.bf16 %v1785_v19  ;;  %v1786_v24 = vunpack.i.l.bf16 %v1785_v19 }
  0xa9   : > { %1834 = vrot.lane.b32.xlu0 %v1833_v52, %s2142_s19  ;;  %v477_v33 = vsel %vm475_vm9, %v1786_v24, %v1787_v23 }
  0xab   : > { %1829 = vrot.lane.b32.xlu1 %v1828_v57, %s2142_s19 }
  0xad   : > { %1849 = vrot.lane.b32.xlu0 %v1848_v61, %s2142_s19 }
  0xaf   : > { %1839 = vrot.lane.b32.xlu1 %v1838_v1, %s2142_s19 }
  0xb1   : > { %1859 = vrot.lane.b32.xlu0 %v1858_v5, %s2142_s19 }
  0xb3   : > { %1844 = vrot.lane.b32.xlu1 %v1843_v8, %s2142_s19 }
  0xb5   : > { %471 = vrot.lane.b32.xlu0 %v395_v11, %s2142_s19 }
  0xb7   : > { %1854 = vrot.lane.b32.xlu1 %v1853_v13, %s2142_s19 }
  0xb9   : > { %473 = vrot.lane.b32.xlu0 %v392_v7, %s2142_s19 }
  0xbb   : > { %469 = vrot.lane.b32.xlu1 %v394_v15, %s2142_s19 }
  0xbf   : > { %467 = vrot.lane.b32.xlu1 %v388_v58, %s2142_s19 }
  0xc3   : > { %400 = vperm.xlu1 %1863, %v397_v16  }
 0x101   : > { %v1790_v17 = vpop.permute.xlu0 %1789 }
 0x102   : > { %v1791_v25 = vunpack.i.l.bf16 %v1790_v17  ;;  %v1792_v29 = vunpack.i.h.bf16 %v1790_v17 }
 0x104   : > { %v478_v34 = vsel %vm475_vm9, %v1787_v23, %v1791_v25 }
 0x105   : > { %v1795_v18 = vpop.permute.xlu0 %1794 }
 0x106   : > { %v1797_v48 = vunpack.i.h.bf16 %v1795_v18  ;;  %v1796_v49 = vunpack.i.l.bf16 %v1795_v18 }
 0x10b   : > { %v2312_v20 = vpop.permute.xlu0 %1804 }
 0x10c   : > { %v1807_v4 = vunpack.i.h.bf16 %v2312_v20  ;;  %v1806_v5 = vunpack.i.l.bf16 %v2312_v20 }
 0x10d   : > { %v2314_v21 = vpop.permute.xlu1 %1799 }
 0x10e   : > { %v1802_v3 = vunpack.i.h.bf16 %v2314_v21  ;;  %v1801_v8 = vunpack.i.l.bf16 %v2314_v21 }
 0x113   : > { %v2316_v22 = vpop.permute.xlu0 %1814 }
 0x114   : > { %v1817_v9 = vunpack.i.h.bf16 %v2316_v22 }
 0x115   : > { %v2318_v26 = vpop.permute.xlu1 %1809 }
 0x116   : > { %v1812_v21 = vunpack.i.h.bf16 %v2318_v26 }
 0x117   : > { %v1820_v28 = vpop.permute.xlu0 %1819 }
 0x118   : > { %v1822_v30 = vunpack.i.h.bf16 %v1820_v28  ;;  %v1821_v31 = vunpack.i.l.bf16 %v1820_v28 }
 0x119   : > { %v1825_v32 = vpop.permute.xlu1 %1824 }
 0x11a   : > { %v1827_v35 = vunpack.i.h.bf16 %v1825_v32  ;;  %v1826_v36 = vunpack.i.l.bf16 %v1825_v32  ;;  %v480_v37 = vsel %vm475_vm9, %v1821_v31, %v1822_v30  ;;  %v481_v38 = vsel %vm475_vm9, %v1822_v30, %v1792_v29 }
 0x11b   : > { %v1835_v39 = vpop.permute.xlu0 %1834  ;;  %v1626_v40 = vpack.c.bf16 %v480_v37, %v477_v33  ;;  %v1643_v41 = vpack.c.bf16 %v481_v38, %v478_v34  ;;  %v1816_v30 = vunpack.i.l.bf16 %v2316_v22 }
 0x11c   : > { %v1837_v42 = vunpack.i.h.bf16 %v1835_v39  ;;  %v1836_v43 = vunpack.i.l.bf16 %v1835_v39  ;;  %v476_v44 = vsel %vm475_vm9, %v1826_v36, %v1786_v24  ;;  %v479_v45 = vsel %vm475_vm9, %v1827_v35, %v1821_v31 }
 0x11d   : > { %v1830_v46 = vpop.permute.xlu1 %1829  ;;  %1627 = vmatprep.subr.bf16.mxu0 %v1626_v40  ;;  %1644 = vmatpush3.bf16.msra.mxu1 %v1643_v41  ;;  %v1628_v47 = vpack.c.bf16 %v479_v45, %v476_v44  ;;  %v1811_v31 = vunpack.i.l.bf16 %v2318_v26  ;;  %v396_v45 = vld [vmem:[%s2627_s2] sm:$0xff] }
 0x11e   : > { %v1832_v50 = vunpack.i.h.bf16 %v1830_v46  ;;  %v1831_v51 = vunpack.i.l.bf16 %v1830_v46  ;;  %1645 = vmatprep.subr.bf16.mxu1 %v2143_v27  ;;  %v486_v54 = vsel %vm475_vm9, %v1836_v43, %v1837_v42  ;;  %v487_v56 = vsel %vm475_vm9, %v1837_v42, %v1797_v48 }
 0x11f   : > { %v1850_v52 = vpop.permute.xlu0 %1849  ;;  %1629 = vmatpush1.bf16.msra.mxu0 %v1628_v47  ;;  %v685_v48 = vlaneseq }
 0x120   : > { %v483_v53 = vsel %vm475_vm9, %v1831_v51, %v1832_v50  ;;  %v484_v55 = vsel %vm475_vm9, %v1832_v50, %v1796_v49  ;;  %v1852_v62 = vunpack.i.h.bf16 %v1850_v52  ;;  %v1851_v63 = vunpack.i.l.bf16 %v1850_v52  ;;  %v306_v52 = vld [vmem:[%s2626_s1] sm:$0x7] }
 0x121   : > { %v1840_v57 = vpop.permute.xlu1 %1839  ;;  %v1630_v58 = vpack.c.bf16 %v486_v54, %v483_v53  ;;  %v1646_v59 = vpack.c.bf16 %v487_v56, %v484_v55  ;;  %v686_v49 = vshrl.u32 %v685_v48, 7 }
 0x122   : > { %v1842_v60 = vunpack.i.h.bf16 %v1840_v57  ;;  %v1841_v61 = vunpack.i.l.bf16 %v1840_v57  ;;  %v492_v15 = vsel %vm475_vm9, %v1851_v63, %v1852_v62  ;;  %v493_v16 = vsel %vm475_vm9, %v1852_v62, %v1807_v4 }
 0x123   : > { %v1860_v0 = vpop.permute.xlu0 %1859  ;;  %1631 = vmatprep.subr.bf16.mxu0 %v1630_v58  ;;  %1647 = vmatpush3.bf16.msra.mxu1 %v1646_v59  ;;  %v491_v20 = vsel %vm475_vm9, %v1802_v3, %v1851_v63  ;;  %v687_v53 = vsub.s32 0, %v686_v49  ;;  %v691_v55 = vsub.s32 1, %v686_v49 }
 0x124   : > { %v482_v1 = vsel %vm475_vm9, %v1841_v61, %v1831_v51  ;;  %v485_v2 = vsel %vm475_vm9, %v1842_v60, %v1836_v43  ;;  %1648 = vmatprep.subr.bf16.mxu1 %v2143_v27  ;;  %v1862_v13 = vunpack.i.h.bf16 %v1860_v0  ;;  %v1861_v14 = vunpack.i.l.bf16 %v1860_v0 }
 0x125   : > { %v1845_v6 = vpop.permute.xlu1 %1844  ;;  %v1632_v7 = vpack.c.bf16 %v485_v2, %v482_v1  ;;  %v695_v51 = vsub.s32 2, %v686_v49  ;;  %v2373_v63 = vrot.slane %v306_v52, %v687_v53  ;;  %v2375_v2 = vrot.slane %v306_v52, %v691_v55 }
 0x126   : > { %v1847_v10 = vunpack.i.h.bf16 %v1845_v6  ;;  %v1846_v11 = vunpack.i.l.bf16 %v1845_v6  ;;  %v498_v34 = vsel %vm475_vm9, %v1861_v14, %v1862_v13  ;;  %v499_v35 = vsel %vm475_vm9, %v1862_v13, %v1817_v9 }
 0x127   : > { %1633 = vmatpush1.bf16.msra.mxu0 %v1632_v7  ;;  %v472_v24 = vpop.permute.xlu0 %471  ;;  %v497_v36 = vsel %vm475_vm9, %v1812_v21, %v1861_v14  ;;  %v2371_v59 = vrot.slane %v306_v52, %v695_v51 }
 0x128   : > { %v489_v17 = vsel %vm475_vm9, %v1846_v11, %v1847_v10  ;;  %v490_v18 = vsel %vm475_vm9, %v1847_v10, %v1806_v5  ;;  %v488_v19 = vsel %vm475_vm9, %v1801_v8, %v1846_v11 }
 0x129   : > { %v1855_v23 = vpop.permute.xlu1 %1854  ;;  %v1634_v25 = vpack.c.bf16 %v492_v15, %v489_v17  ;;  %v1649_v28 = vpack.c.bf16 %v493_v16, %v490_v18  ;;  %v1636_v29 = vpack.c.bf16 %v491_v20, %v488_v19 }
 0x12a   : > { %v1857_v32 = vunpack.i.h.bf16 %v1855_v23  ;;  %v1856_v33 = vunpack.i.l.bf16 %v1855_v23 }
 0x12b   : > { %1635 = vmatprep.subr.bf16.mxu0 %v1634_v25  ;;  %1650 = vmatpush3.bf16.msra.mxu1 %v1649_v28  ;;  %v474_v42 = vpop.permute.xlu0 %473 }
 0x12c   : > { %1637 = vmatpush1.bf16.msra.mxu0 %v1636_v29  ;;  %1651 = vmatprep.subr.bf16.mxu1 %v2143_v27  ;;  %v495_v37 = vsel %vm475_vm9, %v1856_v33, %v1857_v32  ;;  %v496_v38 = vsel %vm475_vm9, %v1857_v32, %v1816_v30  ;;  %v494_v22 = vsel %vm475_vm9, %v1811_v31, %v1856_v33 }
 0x12d   : > { %v470_v26 = vpop.permute.xlu1 %469  ;;  %v1638_v39 = vpack.c.bf16 %v498_v34, %v495_v37  ;;  %v1652_v40 = vpack.c.bf16 %v499_v35, %v496_v38  ;;  %v1640_v41 = vpack.c.bf16 %v497_v36, %v494_v22  ;;  %v502_v46 = vsel %vm475_vm9, %v472_v24, %v474_v42 }
 0x12e   : > { %v501_v43 = vsel %vm475_vm9, %v470_v26, %v472_v24 }
 0x12f   : > { %1639 = vmatprep.subr.bf16.mxu0 %v1638_v39  ;;  %1653 = vmatpush3.bf16.msra.mxu1 %v1652_v40 }
 0x130   : > { %1641 = vmatpush1.bf16.msra.mxu0 %v1640_v41  ;;  %1579 = vmatprep.subr.mxu1 %v2144_v12 }
 0x131   : > { %v468_v44 = vpop.permute.xlu1 %467  ;;  %550 = vmatprep.subr.mxu0 %v501_v43 }
 0x132   : > { %v500_v47 = vsel %vm475_vm9, %v468_v44, %v470_v26 }
 0x133   : > { %1580 = vmatpush3.msra.mxu1 %v502_v46 }
 0x134   : > { %551 = vmatpush1.msra.mxu0 %v500_v47  ;;  %1582 = vmatmul.mubr.msk.f32.vlgmr.msra.gmra.mrb[0].mxu1 %vm530_vm10, %v396_v45 }
 0x135   : > { %1525 = vmatmul.mubr.msk.f32.vlgmr.msra.gmra.mrb[0].mxu0 %vm530_vm10, %v396_v45  ;;  %1670 = vmatprep.subr.bf16.mxu1 %v2143_v27 }
 0x136   : > { %1602 = vmatprep.mubr.msk.f32.mxu1 %vm2145_vm8, %v2144_v12  ;;  %993 = vmatprep.mubr.f32.mxu0 %v2144_v12 }
 0x142   : > { %v401_v50 = vpop.permute.xlu1 %400 }
 0x207   : > { %v671_v54 = vpop.f32.mrb[0].mxu1 }
 0x208   : > { %v672_v56 = vadd.f32 %v671_v54, %v401_v50  ;;  %v600_v57 = vpop.f32.mrb[0].mxu0  ;;  %v1583_v58 = vpop.f32.mrb[1].mxu1 }
 0x209   : > { %v601_v60 = vadd.f32 %v600_v57, %v401_v50  ;;  %v602_v61 = vpop.f32.mrb[1].mxu0 }
 0x20a   : > { %vm677_vm12 = vcmp.ge.f32.partialorder %v672_v56, 0.0  ;;  %v680_v62 = vmul.f32 0.1, %v672_v56  ;;  %v603_v0 = vadd.f32 %v602_v61, %v401_v50 }
 0x20b   : > { %vm675_vm13 = vcmp.ge.f32.partialorder %v601_v60, 0.0  ;;  %v678_v1 = vmul.f32 0.1, %v601_v60 }
 0x20c   : > { %v683_v3 = vsel %vm677_vm12, %v672_v56, %v680_v62  ;;  %vm676_vm14 = vcmp.ge.f32.partialorder %v603_v0, 0.0  ;;  %v679_v4 = vmul.f32 0.1, %v603_v0 }
 0x20d   : > { %v702_v5 = vmul.f32 %v2371_v59, %v683_v3  ;;  %v681_v6 = vsel %vm675_vm13, %v601_v60, %v678_v1 }
 0x20e   : > { %v700_v7 = vmul.f32 %v2373_v63, %v681_v6  ;;  %v682_v8 = vsel %vm676_vm14, %v603_v0, %v679_v4 }
 0x20f   : > { %711 = vst.msk [vmem:[#allocation2 + $0x18] sm:$0xff] %vm707_vm11, %v702_v5  ;;  %v701_v9 = vmul.f32 %v2375_v2, %v682_v8 }
 0x211   : > { %v1879_v10 = vpack.i.bf16 %v701_v9, %v700_v7 }
 0x213   : > { %1880 = vrot.lane.b32.xlu0 %v1879_v10, %s2135_s12 }
 0x216   : > { %v715_v11 = vld [vmem:[#allocation2 + $0x18] sm:$0xff] }
 0x217   : > { %v1864_v13 = vpack.i.bf16 %v2144_v12, %v715_v11  ;;  %1885 = vrot.lane.b32.xlu0 %v1879_v10, %s2134_s11 }
 0x219   : > { %1865 = vrot.lane.b32.xlu1 %v1864_v13, %s2135_s12 }
 0x21b   : > { %1890 = vrot.lane.b32.xlu0 %v1879_v10, %s2136_s13 }
 0x21d   : > { %1870 = vrot.lane.b32.xlu1 %v1864_v13, %s2134_s11 }
 0x21f   : > { %1895 = vrot.lane.b32.xlu0 %v1879_v10, %s2137_s14 }
 0x221   : > { %1875 = vrot.lane.b32.xlu1 %v1864_v13, %s2136_s13 }
 0x223   : > { %1900 = vrot.lane.b32.xlu0 %v1879_v10, %s2138_s15 }
 0x225   : > { %757 = vrot.lane.b32.xlu1 %v715_v11, %s2137_s14 }
 0x227   : > { %1905 = vrot.lane.b32.xlu0 %v1879_v10, %s2139_s16 }
 0x229   : > { %765 = vrot.lane.b32.xlu1 %v715_v11, %s2138_s15 }
 0x22b   : > { %1910 = vrot.lane.b32.xlu0 %v1879_v10, %s2140_s17 }
 0x22d   : > { %773 = vrot.lane.b32.xlu1 %v715_v11, %s2139_s16 }
 0x22f   : > { %785 = vrot.lane.b32.xlu0 %v700_v7, %s2141_s18 }
 0x231   : > { %781 = vrot.lane.b32.xlu1 %v715_v11, %s2140_s17 }
 0x233   : > { %789 = vrot.lane.b32.xlu0 %v715_v11, %s2141_s18 }
 0x235   : > { %787 = vrot.lane.b32.xlu1 %v701_v9, %s2141_s18 }
 0x239   : > { %1915 = vrot.lane.b32.xlu1 %v1879_v10, %s2142_s19 }
 0x285   : > { %v1881_v14 = vpop.permute.xlu0 %1880 }
 0x286   : > { %v1882_v39 = vunpack.i.l.bf16 %v1881_v14  ;;  %v1883_v44 = vunpack.i.h.bf16 %v1881_v14 }
 0x288   : > { %v729_v55 = vsel %vm323_vm0, %v1882_v39, %v1883_v44 }
 0x289   : > { %v1886_v15 = vpop.permute.xlu0 %1885 }
 0x28a   : > { %v1887_v50 = vunpack.i.l.bf16 %v1886_v15  ;;  %v1888_v53 = vunpack.i.h.bf16 %v1886_v15 }
 0x28b   : > { %v1866_v16 = vpop.permute.xlu1 %1865 }
 0x28c   : > { %v1867_v17 = vunpack.i.l.bf16 %v1866_v16  ;;  %v1868_v37 = vunpack.i.h.bf16 %v1866_v16  ;;  %v740_v3 = vsel %vm335_vm2, %v1887_v50, %v1888_v53 }
 0x28d   : > { %v1891_v18 = vpop.permute.xlu0 %1890 }
 0x28e   : > { %v1919_v19 = vpack.i.bf16 %v1867_v17, %v715_v11  ;;  %v728_v43 = vsel %vm323_vm0, %v1868_v37, %v1882_v39  ;;  %v1892_v46 = vunpack.i.l.bf16 %v1891_v18  ;;  %v730_v51 = vsel %vm323_vm0, %v1883_v44, %v1867_v17 }
 0x28f   : > { %v1871_v20 = vpop.permute.xlu1 %1870  ;;  %v1949_v49 = vpack.i.bf16 %v728_v43, %v2144_v12  ;;  %v1893_v54 = vunpack.i.h.bf16 %v1891_v18  ;;  %v1959_v57 = vpack.i.bf16 %v730_v51, %v729_v55 }
 0x290   : > { %1920 = vrot.lane.b32.xlu0 %v1919_v19, %s2142_s19  ;;  %v1872_v24 = vunpack.i.l.bf16 %v1871_v20  ;;  %v1873_v45 = vunpack.i.h.bf16 %v1871_v20 }
 0x291   : > { %v1896_v21 = vpop.permute.xlu0 %1895  ;;  %v751_v1 = vsel %vm347_vm1, %v1892_v46, %v1893_v54 }
 0x292   : > { %v1897_v30 = vunpack.i.l.bf16 %v1896_v21  ;;  %v739_v56 = vsel %vm335_vm2, %v1873_v45, %v1887_v50  ;;  %v741_v61 = vsel %vm335_vm2, %v1888_v53, %v1872_v24  ;;  %v1898_v62 = vunpack.i.h.bf16 %v1896_v21 }
 0x293   : > { %v1876_v23 = vpop.permute.xlu1 %1875  ;;  %v1964_v5 = vpack.i.bf16 %v741_v61, %v740_v3 }
 0x294   : > { %v1877_v25 = vunpack.i.l.bf16 %v1876_v23  ;;  %v1878_v42 = vunpack.i.h.bf16 %v1876_v23  ;;  %v759_v11 = vsel %vm357_vm5, %v1897_v30, %v1898_v62 }
 0x295   : > { %v1901_v28 = vpop.permute.xlu0 %1900 }
 0x296   : > { %v1924_v29 = vpack.i.bf16 %v1877_v25, %v1872_v24  ;;  %v1902_v31 = vunpack.i.l.bf16 %v1901_v28  ;;  %v750_v52 = vsel %vm347_vm1, %v1878_v42, %v1892_v46  ;;  %v752_v60 = vsel %vm347_vm1, %v1893_v54, %v1877_v25 }
 0x297   : > { %v758_v32 = vpop.permute.xlu1 %757  ;;  %v1954_v58 = vpack.i.bf16 %v750_v52, %v739_v56  ;;  %v1903_v0 = vunpack.i.h.bf16 %v1901_v28  ;;  %v1969_v4 = vpack.i.bf16 %v752_v60, %v751_v1 }
 0x298   : > { %1925 = vrot.lane.b32.xlu0 %v1924_v29, %s2142_s19  ;;  %v1939_v33 = vpack.i.bf16 %v1902_v31, %v1897_v30  ;;  %v760_v7 = vsel %vm357_vm5, %v1898_v62, %v758_v32  ;;  %v794_v29 = vld [vmem:[%s2630_s5] sm:$0xff] }
 0x299   : > { %v1906_v34 = vpop.permute.xlu0 %1905  ;;  %v767_v10 = vsel %vm366_vm3, %v1902_v31, %v1903_v0  ;;  %v1974_v14 = vpack.i.bf16 %v760_v7, %v759_v11 }
 0x29a   : > { %1940 = vrot.lane.b32.xlu1 %v1939_v33, %s2142_s19  ;;  %v1907_v22 = vunpack.i.l.bf16 %v1906_v34  ;;  %v1908_v8 = vunpack.i.h.bf16 %v1906_v34 }
 0x29b   : > { %v766_v35 = vpop.permute.xlu1 %765 }
 0x29c   : > { %v1929_v36 = vpack.i.bf16 %v766_v35, %v758_v32  ;;  %v768_v6 = vsel %vm366_vm3, %v1903_v0, %v766_v35  ;;  %v775_v19 = vsel %vm375_vm6, %v1907_v22, %v1908_v8 }
 0x29d   : > { %v1911_v38 = vpop.permute.xlu0 %1910  ;;  %v1979_v13 = vpack.i.bf16 %v768_v6, %v767_v10 }
 0x29e   : > { %1930 = vrot.lane.b32.xlu0 %v1929_v36, %s2142_s19  ;;  %v1912_v26 = vunpack.i.l.bf16 %v1911_v38  ;;  %v1913_v9 = vunpack.i.h.bf16 %v1911_v38 }
 0x29f   : > { %v774_v40 = vpop.permute.xlu1 %773 }
 0x2a0   : > { %v1944_v41 = vpack.i.bf16 %v1912_v26, %v1907_v22  ;;  %v776_v16 = vsel %vm375_vm6, %v1908_v8, %v774_v40  ;;  %v783_v18 = vsel %vm384_vm4, %v1912_v26, %v1913_v9 }
 0x2a1   : > { %v786_v17 = vpop.permute.xlu0 %785  ;;  %v1984_v21 = vpack.i.bf16 %v776_v16, %v775_v19 }
 0x2a2   : > { %1945 = vrot.lane.b32.xlu1 %v1944_v41, %s2142_s19 }
 0x2a3   : > { %v782_v47 = vpop.permute.xlu1 %781 }
 0x2a4   : > { %v1934_v48 = vpack.i.bf16 %v782_v47, %v774_v40  ;;  %v784_v15 = vsel %vm384_vm4, %v1913_v9, %v782_v47 }
 0x2a5   : > { %v1989_v20 = vpack.i.bf16 %v784_v15, %v783_v18  ;;  %v790_v24 = vpop.permute.xlu0 %789 }
 0x2a6   : > { %1935 = vrot.lane.b32.xlu0 %v1934_v48, %s2142_s19  ;;  %1950 = vrot.lane.b32.xlu1 %v1949_v49, %s2142_s19 }
 0x2a7   : > { %v788_v23 = vpop.permute.xlu1 %787 }
 0x2a8   : > { %v792_v25 = vsel %vm393_vm7, %v788_v23, %v790_v24  ;;  %v791_v28 = vsel %vm393_vm7, %v786_v17, %v788_v23 }
 0x2aa   : > { %1960 = vrot.lane.b32.xlu0 %v1959_v57, %s2142_s19  ;;  %1955 = vrot.lane.b32.xlu1 %v1954_v58, %s2142_s19 }
 0x2ab   : > { %v1916_v30 = vpop.permute.xlu1 %1915 }
 0x2ac   : > { %v1918_v36 = vunpack.i.h.bf16 %v1916_v30  ;;  %v1917_v37 = vunpack.i.l.bf16 %v1916_v30 }
 0x2ae   : > { %1970 = vrot.lane.b32.xlu0 %v1969_v4, %s2142_s19  ;;  %1965 = vrot.lane.b32.xlu1 %v1964_v5, %s2142_s19  ;;  %v873_v42 = vsel %vm475_vm9, %v1917_v37, %v1918_v36 }
 0x2b2   : > { %1980 = vrot.lane.b32.xlu0 %v1979_v13, %s2142_s19  ;;  %1975 = vrot.lane.b32.xlu1 %v1974_v14, %s2142_s19 }
 0x2b6   : > { %1990 = vrot.lane.b32.xlu0 %v1989_v20, %s2142_s19  ;;  %1985 = vrot.lane.b32.xlu1 %v1984_v21, %s2142_s19 }
 0x2ba   : > { %868 = vrot.lane.b32.xlu0 %v792_v25, %s2142_s19  ;;  %866 = vrot.lane.b32.xlu1 %v791_v28, %s2142_s19 }
 0x2be   : > { %870 = vrot.lane.b32.xlu0 %v790_v24, %s2142_s19  ;;  %864 = vrot.lane.b32.xlu1 %v786_v17, %s2142_s19 }
 0x2c2   : > { %797 = vperm.xlu1 %1863, %v794_v29  }
 0x302   : > { %v1921_v31 = vpop.permute.xlu0 %1920 }
 0x303   : > { %v1922_v26 = vunpack.i.l.bf16 %v1921_v31  ;;  %v1923_v40 = vunpack.i.h.bf16 %v1921_v31 }
 0x305   : > { %v874_v44 = vsel %vm475_vm9, %v1918_v36, %v1922_v26 }
 0x30a   : > { %v1926_v32 = vpop.permute.xlu0 %1925 }
 0x30b   : > { %v1928_v48 = vunpack.i.h.bf16 %v1926_v32  ;;  %v1927_v49 = vunpack.i.l.bf16 %v1926_v32 }
 0x30c   : > { %v2442_v33 = vpop.permute.xlu1 %1940 }
 0x30d   : > { %v1943_v50 = vunpack.i.h.bf16 %v2442_v33  ;;  %v1942_v7 = vunpack.i.l.bf16 %v2442_v33 }
 0x310   : > { %v2444_v34 = vpop.permute.xlu0 %1930 }
 0x311   : > { %v1933_v5 = vunpack.i.h.bf16 %v2444_v34  ;;  %v1932_v6 = vunpack.i.l.bf16 %v2444_v34 }
 0x314   : > { %v2446_v35 = vpop.permute.xlu1 %1945 }
 0x315   : > { %v1948_v8 = vunpack.i.h.bf16 %v2446_v35  ;;  %v1947_v29 = vunpack.i.l.bf16 %v2446_v35 }
 0x318   : > { %v2448_v38 = vpop.permute.xlu0 %1935  ;;  %v1951_v22 = vpop.permute.xlu1 %1950 }
 0x319   : > { %v1952_v39 = vunpack.i.l.bf16 %v1951_v22  ;;  %v1953_v47 = vunpack.i.h.bf16 %v1951_v22  ;;  %v1938_v25 = vunpack.i.h.bf16 %v2448_v38  ;;  %v1937_v28 = vunpack.i.l.bf16 %v2448_v38 }
 0x31b   : > { %v872_v51 = vsel %vm475_vm9, %v1952_v39, %v1917_v37 }
 0x31c   : > { %v1961_v41 = vpop.permute.xlu0 %1960  ;;  %v1956_v43 = vpop.permute.xlu1 %1955 }
 0x31d   : > { %v1963_v45 = vunpack.i.h.bf16 %v1961_v41  ;;  %v1962_v46 = vunpack.i.l.bf16 %v1961_v41  ;;  %v1958_v55 = vunpack.i.h.bf16 %v1956_v43  ;;  %v1957_v61 = vunpack.i.l.bf16 %v1956_v43 }
 0x31f   : > { %v877_v52 = vsel %vm475_vm9, %v1963_v45, %v1923_v40  ;;  %v875_v53 = vsel %vm475_vm9, %v1953_v47, %v1962_v46  ;;  %v876_v54 = vsel %vm475_vm9, %v1962_v46, %v1963_v45 }
 0x320   : > { %v1671_v56 = vpack.c.bf16 %v877_v52, %v874_v44  ;;  %v1656_v57 = vpack.c.bf16 %v875_v53, %v872_v51  ;;  %v1971_v58 = vpop.permute.xlu0 %1970  ;;  %v1654_v60 = vpack.c.bf16 %v876_v54, %v873_v42  ;;  %v1966_v62 = vpop.permute.xlu1 %1965 }
 0x321   : > { %v1973_v0 = vunpack.i.h.bf16 %v1971_v58  ;;  %v1972_v1 = vunpack.i.l.bf16 %v1971_v58  ;;  %v1968_v3 = vunpack.i.h.bf16 %v1966_v62  ;;  %v1967_v4 = vunpack.i.l.bf16 %v1966_v62 }
 0x322   : > { %1655 = vmatprep.subr.bf16.mxu0 %v1654_v60  ;;  %1672 = vmatpush3.bf16.msra.mxu1 %v1671_v56 }
 0x323   : > { %v883_v9 = vsel %vm475_vm9, %v1973_v0, %v1928_v48  ;;  %v881_v10 = vsel %vm475_vm9, %v1958_v55, %v1972_v1  ;;  %1657 = vmatpush1.bf16.msra.mxu0 %v1656_v57  ;;  %v878_v11 = vsel %vm475_vm9, %v1957_v61, %v1967_v4  ;;  %v880_v13 = vsel %vm475_vm9, %v1968_v3, %v1927_v49  ;;  %v793_v57 = vld [vmem:[%s2629_s4] sm:$0xff] }
 0x324   : > { %v1981_v14 = vpop.permute.xlu0 %1980  ;;  %v1660_v15 = vpack.c.bf16 %v881_v10, %v878_v11  ;;  %v1674_v16 = vpack.c.bf16 %v883_v9, %v880_v13  ;;  %v1976_v17 = vpop.permute.xlu1 %1975  ;;  %1673 = vmatprep.subr.bf16.mxu1 %v2143_v27  ;;  %v879_v18 = vsel %vm475_vm9, %v1967_v4, %v1968_v3  ;;  %v882_v19 = vsel %vm475_vm9, %v1972_v1, %v1973_v0 }
 0x325   : > { %v1983_v20 = vunpack.i.h.bf16 %v1981_v14  ;;  %v1982_v21 = vunpack.i.l.bf16 %v1981_v14  ;;  %v1978_v23 = vunpack.i.h.bf16 %v1976_v17  ;;  %v1977_v24 = vunpack.i.l.bf16 %v1976_v17 }
 0x326   : > { %v1658_v30 = vpack.c.bf16 %v882_v19, %v879_v18  ;;  %1675 = vmatpush3.bf16.msra.mxu1 %v1674_v16 }
 0x327   : > { %v887_v31 = vsel %vm475_vm9, %v1943_v50, %v1982_v21  ;;  %v889_v32 = vsel %vm475_vm9, %v1983_v20, %v1933_v5  ;;  %v884_v33 = vsel %vm475_vm9, %v1942_v7, %v1977_v24  ;;  %v886_v34 = vsel %vm475_vm9, %v1978_v23, %v1932_v6  ;;  %1676 = vmatprep.subr.bf16.mxu1 %v2143_v27 }
 0x328   : > { %v1991_v36 = vpop.permute.xlu0 %1990  ;;  %v1664_v37 = vpack.c.bf16 %v887_v31, %v884_v33  ;;  %v1677_v22 = vpack.c.bf16 %v889_v32, %v886_v34  ;;  %1659 = vmatprep.subr.bf16.mxu0 %v1658_v30  ;;  %v1986_v26 = vpop.permute.xlu1 %1985  ;;  %v885_v38 = vsel %vm475_vm9, %v1977_v24, %v1978_v23  ;;  %v888_v35 = vsel %vm475_vm9, %v1982_v21, %v1983_v20 }
 0x329   : > { %v1993_v39 = vunpack.i.h.bf16 %v1991_v36  ;;  %v1992_v40 = vunpack.i.l.bf16 %v1991_v36  ;;  %1661 = vmatpush1.bf16.msra.mxu0 %v1660_v15  ;;  %v1988_v41 = vunpack.i.h.bf16 %v1986_v26  ;;  %v1987_v42 = vunpack.i.l.bf16 %v1986_v26 }
 0x32a   : > { %v1662_v43 = vpack.c.bf16 %v888_v35, %v885_v38  ;;  %1678 = vmatpush3.bf16.msra.mxu1 %v1677_v22 }
 0x32b   : > { %v893_v44 = vsel %vm475_vm9, %v1948_v8, %v1992_v40  ;;  %v895_v45 = vsel %vm475_vm9, %v1993_v39, %v1938_v25  ;;  %v890_v46 = vsel %vm475_vm9, %v1947_v29, %v1987_v42  ;;  %v892_v47 = vsel %vm475_vm9, %v1988_v41, %v1937_v28  ;;  %1679 = vmatprep.subr.bf16.mxu1 %v2143_v27 }
 0x32c   : > { %v869_v48 = vpop.permute.xlu0 %868  ;;  %v1680_v49 = vpack.c.bf16 %v895_v45, %v892_v47  ;;  %1663 = vmatprep.subr.bf16.mxu0 %v1662_v43  ;;  %v867_v50 = vpop.permute.xlu1 %866  ;;  %v891_v51 = vsel %vm475_vm9, %v1987_v42, %v1988_v41  ;;  %v894_v52 = vsel %vm475_vm9, %v1992_v40, %v1993_v39  ;;  %v1668_v53 = vpack.c.bf16 %v893_v44, %v890_v46 }
 0x32d   : > { %1665 = vmatpush1.bf16.msra.mxu0 %v1664_v37  ;;  %v1666_v54 = vpack.c.bf16 %v894_v52, %v891_v51  ;;  %v897_v60 = vsel %vm475_vm9, %v867_v50, %v869_v48 }
 0x32e   : > { %1681 = vmatpush3.bf16.msra.mxu1 %v1680_v49 }
 0x32f   : > { %1667 = vmatprep.subr.bf16.mxu0 %v1666_v54  ;;  %1600 = vmatprep.subr.mxu1 %v2144_v12 }
 0x330   : > { %v871_v55 = vpop.permute.xlu0 %870  ;;  %v865_v56 = vpop.permute.xlu1 %864 }
 0x331   : > { %v898_v58 = vsel %vm475_vm9, %v869_v48, %v871_v55  ;;  %1669 = vmatpush1.bf16.msra.mxu0 %v1668_v53  ;;  %v896_v61 = vsel %vm475_vm9, %v865_v56, %v867_v50 }
 0x332   : > { %945 = vmatprep.subr.mxu0 %v897_v60  ;;  %1601 = vmatpush3.msra.mxu1 %v898_v58 }
 0x333   : > { %1603 = vmatmul.mubr.msk.f32.vlgmr.msra.gmra.mrb[2].mxu1 %vm530_vm10, %v793_v57  ;;  %1698 = vmatprep.subr.bf16.mxu1 %v2143_v27 }
 0x334   : > { %1623 = vmatprep.mubr.msk.f32.mxu1 %vm2145_vm8, %v2144_v12 }
 0x335   : > { %946 = vmatpush1.msra.mxu0 %v896_v61 }
 0x336   : > { %1527 = vmatmul.mubr.msk.f32.vlgmr.msra.gmra.mrb[2].mxu0 %vm530_vm10, %v793_v57 }
 0x337   : > { %1371 = vmatprep.mubr.f32.mxu0 %v2144_v12 }
 0x341   : > { %v798_v62 = vpop.permute.xlu1 %797 }
 0x406   : > { %v1066_v0 = vpop.f32.mrb[2].mxu1 }
 0x407   : > { %v1067_v1 = vadd.f32 %v1066_v0, %v798_v62  ;;  %v1604_v3 = vpop.f32.mrb[3].mxu1 }
 0x409   : > { %vm1072_vm15 = vcmp.ge.f32.partialorder %v1067_v1, 0.0  ;;  %v1075_v4 = vmul.f32 0.1, %v1067_v1  ;;  %v995_v5 = vpop.f32.mrb[2].mxu0 }
 0x40a   : > { %v996_v6 = vadd.f32 %v995_v5, %v798_v62  ;;  %v997_v7 = vpop.f32.mrb[3].mxu0 }
 0x40b   : > { %v1078_v8 = vsel %vm1072_vm15, %v1067_v1, %v1075_v4  ;;  %v998_v9 = vadd.f32 %v997_v7, %v798_v62 }
 0x40c   : > { %v1081_v10 = vmul.f32 %v1078_v8, %v2371_v59  ;;  %vm1070_vm12 = vcmp.ge.f32.partialorder %v996_v6, 0.0  ;;  %v1073_v11 = vmul.f32 0.1, %v996_v6 }
 0x40d   : > { %vm1071_vm8 = vcmp.ge.f32.partialorder %v998_v9, 0.0  ;;  %v1074_v13 = vmul.f32 0.1, %v998_v9 }
 0x40e   : > { %1089 = vst.msk [vmem:[#allocation3 + $0x18] sm:$0xff] %vm707_vm11, %v1081_v10  ;;  %v1076_v14 = vsel %vm1070_vm12, %v996_v6, %v1073_v11 }
 0x40f   : > { %v1079_v15 = vmul.f32 %v1076_v14, %v2373_v63  ;;  %v1077_v16 = vsel %vm1071_vm8, %v998_v9, %v1074_v13 }
 0x410   : > { %v1080_v17 = vmul.f32 %v1077_v16, %v2375_v2 }
 0x412   : > { %v2009_v18 = vpack.i.bf16 %v1080_v17, %v1079_v15 }
 0x414   : > { %2010 = vrot.lane.b32.xlu0 %v2009_v18, %s2135_s12 }
 0x415   : > { %v1093_v19 = vld [vmem:[#allocation3 + $0x18] sm:$0xff] }
 0x416   : > { %v1994_v20 = vpack.i.bf16 %v2144_v12, %v1093_v19 }
 0x418   : > { %1995 = vrot.lane.b32.xlu1 %v1994_v20, %s2135_s12  ;;  %2015 = vrot.lane.b32.xlu0 %v2009_v18, %s2134_s11 }
 0x41c   : > { %2000 = vrot.lane.b32.xlu1 %v1994_v20, %s2134_s11  ;;  %2020 = vrot.lane.b32.xlu0 %v2009_v18, %s2136_s13 }
 0x420   : > { %2005 = vrot.lane.b32.xlu1 %v1994_v20, %s2136_s13  ;;  %2025 = vrot.lane.b32.xlu0 %v2009_v18, %s2137_s14 }
 0x424   : > { %1135 = vrot.lane.b32.xlu1 %v1093_v19, %s2137_s14  ;;  %2030 = vrot.lane.b32.xlu0 %v2009_v18, %s2138_s15  ;;  %s1711_s14 = smul.u32 24, %s2635_s28 }
 0x428   : > { %1143 = vrot.lane.b32.xlu1 %v1093_v19, %s2138_s15  ;;  %2035 = vrot.lane.b32.xlu0 %v2009_v18, %s2139_s16 }
 0x42c   : > { %1151 = vrot.lane.b32.xlu1 %v1093_v19, %s2139_s16  ;;  %2040 = vrot.lane.b32.xlu0 %v2009_v18, %s2140_s17 }
 0x430   : > { %1159 = vrot.lane.b32.xlu1 %v1093_v19, %s2140_s17  ;;  %1163 = vrot.lane.b32.xlu0 %v1079_v15, %s2141_s18  ;;  %s305_s17 = scalar_lea.vmem %s2633_s8, %s1711_s14 }
 0x434   : > { %1165 = vrot.lane.b32.xlu1 %v1080_v17, %s2141_s18  ;;  %1167 = vrot.lane.b32.xlu0 %v1093_v19, %s2141_s18 }
 0x438   : > { %2045 = vrot.lane.b32.xlu1 %v2009_v18, %s2142_s19 }
 0x486   : > { %v2011_v21 = vpop.permute.xlu0 %2010 }
 0x487   : > { %v2012_v47 = vunpack.i.l.bf16 %v2011_v21  ;;  %v2013_v49 = vunpack.i.h.bf16 %v2011_v21 }
 0x489   : > { %v1107_v58 = vsel %vm323_vm0, %v2012_v47, %v2013_v49 }
 0x48a   : > { %v1996_v23 = vpop.permute.xlu1 %1995  ;;  %v2016_v24 = vpop.permute.xlu0 %2015 }
 0x48b   : > { %v1997_v25 = vunpack.i.l.bf16 %v1996_v23  ;;  %v1998_v42 = vunpack.i.h.bf16 %v1996_v23  ;;  %v2017_v60 = vunpack.i.l.bf16 %v2016_v24  ;;  %v2018_v1 = vunpack.i.h.bf16 %v2016_v24 }
 0x48d   : > { %v2049_v28 = vpack.i.bf16 %v1997_v25, %v1093_v19  ;;  %v1106_v50 = vsel %vm323_vm0, %v1998_v42, %v2012_v47  ;;  %v1108_v54 = vsel %vm323_vm0, %v2013_v49, %v1997_v25  ;;  %v1118_v9 = vsel %vm335_vm2, %v2017_v60, %v2018_v1 }
 0x48e   : > { %v2001_v29 = vpop.permute.xlu1 %2000  ;;  %v2021_v30 = vpop.permute.xlu0 %2020  ;;  %v2079_v57 = vpack.i.bf16 %v1106_v50, %v2144_v12  ;;  %v2089_v0 = vpack.i.bf16 %v1108_v54, %v1107_v58 }
 0x48f   : > { %2050 = vrot.lane.b32.xlu0 %v2049_v28, %s2142_s19  ;;  %v2002_v33 = vunpack.i.l.bf16 %v2001_v29  ;;  %v2003_v55 = vunpack.i.h.bf16 %v2001_v29  ;;  %v2022_v56 = vunpack.i.l.bf16 %v2021_v30  ;;  %v2023_v61 = vunpack.i.h.bf16 %v2021_v30 }
 0x491   : > { %v1117_v3 = vsel %vm335_vm2, %v2003_v55, %v2017_v60  ;;  %v1119_v12 = vsel %vm335_vm2, %v2018_v1, %v2002_v33  ;;  %v1129_v6 = vsel %vm347_vm1, %v2022_v56, %v2023_v61 }
 0x492   : > { %v2006_v31 = vpop.permute.xlu1 %2005  ;;  %v2026_v32 = vpop.permute.xlu0 %2025  ;;  %v2094_v13 = vpack.i.bf16 %v1119_v12, %v1118_v9 }
 0x493   : > { %v2007_v34 = vunpack.i.l.bf16 %v2006_v31  ;;  %v2027_v26 = vunpack.i.l.bf16 %v2026_v32  ;;  %v2008_v51 = vunpack.i.h.bf16 %v2006_v31  ;;  %v2028_v10 = vunpack.i.h.bf16 %v2026_v32 }
 0x495   : > { %v2054_v36 = vpack.i.bf16 %v2007_v34, %v2002_v33  ;;  %v1128_v62 = vsel %vm347_vm1, %v2008_v51, %v2022_v56  ;;  %v1130_v4 = vsel %vm347_vm1, %v2023_v61, %v2007_v34  ;;  %v1137_v18 = vsel %vm357_vm5, %v2027_v26, %v2028_v10 }
 0x496   : > { %v1136_v37 = vpop.permute.xlu1 %1135  ;;  %v2031_v22 = vpop.permute.xlu0 %2030  ;;  %v2084_v5 = vpack.i.bf16 %v1128_v62, %v1117_v3  ;;  %v2099_v8 = vpack.i.bf16 %v1130_v4, %v1129_v6 }
 0x497   : > { %2055 = vrot.lane.b32.xlu0 %v2054_v36, %s2142_s19  ;;  %v2032_v38 = vunpack.i.l.bf16 %v2031_v22  ;;  %v2033_v7 = vunpack.i.h.bf16 %v2031_v22  ;;  %v1138_v14 = vsel %vm357_vm5, %v2028_v10, %v1136_v37  ;;  %v1172_v36 = vld [vmem:[%s2632_s7] sm:$0xff] }
 0x498   : > { %v2104_v21 = vpack.i.bf16 %v1138_v14, %v1137_v18 }
 0x499   : > { %v2069_v35 = vpack.i.bf16 %v2032_v38, %v2027_v26  ;;  %v1145_v15 = vsel %vm366_vm3, %v2032_v38, %v2033_v7 }
 0x49a   : > { %v1144_v39 = vpop.permute.xlu1 %1143  ;;  %v2036_v40 = vpop.permute.xlu0 %2035 }
 0x49b   : > { %v2059_v41 = vpack.i.bf16 %v1144_v39, %v1136_v37  ;;  %2070 = vrot.lane.b32.xlu1 %v2069_v35, %s2142_s19  ;;  %v2037_v45 = vunpack.i.l.bf16 %v2036_v40  ;;  %v1146_v11 = vsel %vm366_vm3, %v2033_v7, %v1144_v39  ;;  %v2038_v19 = vunpack.i.h.bf16 %v2036_v40 }
 0x49c   : > { %v2109_v17 = vpack.i.bf16 %v1146_v11, %v1145_v15 }
 0x49d   : > { %2060 = vrot.lane.b32.xlu0 %v2059_v41, %s2142_s19  ;;  %v1153_v29 = vsel %vm375_vm6, %v2037_v45, %v2038_v19 }
 0x49e   : > { %v1152_v43 = vpop.permute.xlu1 %1151  ;;  %v2041_v44 = vpop.permute.xlu0 %2040 }
 0x49f   : > { %v2042_v46 = vunpack.i.l.bf16 %v2041_v44  ;;  %v2043_v16 = vunpack.i.h.bf16 %v2041_v44  ;;  %v1154_v24 = vsel %vm375_vm6, %v2038_v19, %v1152_v43 }
 0x4a0   : > { %v2114_v30 = vpack.i.bf16 %v1154_v24, %v1153_v29 }
 0x4a1   : > { %v2074_v48 = vpack.i.bf16 %v2042_v46, %v2037_v45  ;;  %v1161_v25 = vsel %vm384_vm4, %v2042_v46, %v2043_v16 }
 0x4a2   : > { %v1160_v52 = vpop.permute.xlu1 %1159  ;;  %v1164_v23 = vpop.permute.xlu0 %1163 }
 0x4a3   : > { %v2064_v53 = vpack.i.bf16 %v1160_v52, %v1152_v43  ;;  %2075 = vrot.lane.b32.xlu1 %v2074_v48, %s2142_s19  ;;  %v1162_v20 = vsel %vm384_vm4, %v2043_v16, %v1160_v52 }
 0x4a4   : > { %v2119_v28 = vpack.i.bf16 %v1162_v20, %v1161_v25 }
 0x4a5   : > { %2065 = vrot.lane.b32.xlu0 %v2064_v53, %s2142_s19 }
 0x4a6   : > { %v1166_v31 = vpop.permute.xlu1 %1165  ;;  %v1168_v32 = vpop.permute.xlu0 %1167 }
 0x4a7   : > { %2080 = vrot.lane.b32.xlu1 %v2079_v57, %s2142_s19  ;;  %v1170_v33 = vsel %vm393_vm7, %v1166_v31, %v1168_v32  ;;  %v1169_v34 = vsel %vm393_vm7, %v1164_v23, %v1166_v31 }
 0x4a9   : > { %2090 = vrot.lane.b32.xlu0 %v2089_v0, %s2142_s19 }
 0x4aa   : > { %v2046_v22 = vpop.permute.xlu1 %2045 }
 0x4ab   : > { %2085 = vrot.lane.b32.xlu1 %v2084_v5, %s2142_s19  ;;  %v2048_v41 = vunpack.i.h.bf16 %v2046_v22  ;;  %v2047_v42 = vunpack.i.l.bf16 %v2046_v22 }
 0x4ad   : > { %2100 = vrot.lane.b32.xlu0 %v2099_v8, %s2142_s19  ;;  %v1251_v52 = vsel %vm475_vm9, %v2047_v42, %v2048_v41 }
 0x4af   : > { %2095 = vrot.lane.b32.xlu1 %v2094_v13, %s2142_s19 }
 0x4b1   : > { %2110 = vrot.lane.b32.xlu0 %v2109_v17, %s2142_s19 }
 0x4b3   : > { %2105 = vrot.lane.b32.xlu1 %v2104_v21, %s2142_s19 }
 0x4b5   : > { %2120 = vrot.lane.b32.xlu0 %v2119_v28, %s2142_s19 }
 0x4b7   : > { %2115 = vrot.lane.b32.xlu1 %v2114_v30, %s2142_s19 }
 0x4b9   : > { %1246 = vrot.lane.b32.xlu0 %v1170_v33, %s2142_s19 }
 0x4bb   : > { %1244 = vrot.lane.b32.xlu1 %v1169_v34, %s2142_s19 }
 0x4bd   : > { %1248 = vrot.lane.b32.xlu0 %v1168_v32, %s2142_s19 }
 0x4bf   : > { %1242 = vrot.lane.b32.xlu1 %v1164_v23, %s2142_s19 }
 0x4c3   : > { %1175 = vperm.xlu1 %1863, %v1172_v36  }
 0x501   : > { %v2051_v37 = vpop.permute.xlu0 %2050 }
 0x502   : > { %v2052_v43 = vunpack.i.l.bf16 %v2051_v37  ;;  %v2053_v47 = vunpack.i.h.bf16 %v2051_v37 }
 0x504   : > { %v1252_v51 = vsel %vm475_vm9, %v2048_v41, %v2052_v43 }
 0x509   : > { %v2056_v26 = vpop.permute.xlu0 %2055 }
 0x50a   : > { %v2058_v0 = vunpack.i.h.bf16 %v2056_v26  ;;  %v2057_v4 = vunpack.i.l.bf16 %v2056_v26 }
 0x50d   : > { %v2563_v38 = vpop.permute.xlu1 %2070 }
 0x50e   : > { %v2073_v5 = vunpack.i.h.bf16 %v2563_v38  ;;  %v2072_v13 = vunpack.i.l.bf16 %v2563_v38 }
 0x50f   : > { %v2565_v35 = vpop.permute.xlu0 %2060 }
 0x510   : > { %v2063_v11 = vunpack.i.h.bf16 %v2565_v35  ;;  %v2062_v21 = vunpack.i.l.bf16 %v2565_v35 }
 0x515   : > { %v2567_v39 = vpop.permute.xlu1 %2075 }
 0x516   : > { %v2078_v23 = vunpack.i.h.bf16 %v2567_v39  ;;  %v2077_v43 = vunpack.i.l.bf16 %v2567_v39 }
 0x517   : > { %v2569_v40 = vpop.permute.xlu0 %2065 }
 0x518   : > { %v2068_v33 = vunpack.i.h.bf16 %v2569_v40 }
 0x519   : > { %v2081_v44 = vpop.permute.xlu1 %2080 }
 0x51a   : > { %v2082_v45 = vunpack.i.l.bf16 %v2081_v44  ;;  %v2083_v50 = vunpack.i.h.bf16 %v2081_v44 }
 0x51b   : > { %v2091_v46 = vpop.permute.xlu0 %2090 }
 0x51c   : > { %v2093_v48 = vunpack.i.h.bf16 %v2091_v46  ;;  %v2092_v49 = vunpack.i.l.bf16 %v2091_v46  ;;  %v1250_v55 = vsel %vm475_vm9, %v2082_v45, %v2047_v42  ;;  %v2067_v42 = vunpack.i.l.bf16 %v2569_v40 }
 0x51d   : > { %v2086_v53 = vpop.permute.xlu1 %2085 }
 0x51e   : > { %v1255_v54 = vsel %vm475_vm9, %v2093_v48, %v2053_v47  ;;  %v1253_v56 = vsel %vm475_vm9, %v2083_v50, %v2092_v49  ;;  %v1254_v57 = vsel %vm475_vm9, %v2092_v49, %v2093_v48  ;;  %v2088_v12 = vunpack.i.h.bf16 %v2086_v53 }
 0x51f   : > { %v1699_v58 = vpack.c.bf16 %v1255_v54, %v1252_v51  ;;  %v1684_v60 = vpack.c.bf16 %v1253_v56, %v1250_v55  ;;  %v2101_v61 = vpop.permute.xlu0 %2100  ;;  %v1682_v62 = vpack.c.bf16 %v1254_v57, %v1251_v52  ;;  %v2087_v8 = vunpack.i.l.bf16 %v2086_v53 }
 0x520   : > { %v2103_v1 = vunpack.i.h.bf16 %v2101_v61  ;;  %v2102_v3 = vunpack.i.l.bf16 %v2101_v61 }
 0x521   : > { %1683 = vmatprep.subr.bf16.mxu0 %v1682_v62  ;;  %1700 = vmatpush3.bf16.msra.mxu1 %v1699_v58  ;;  %v2096_v6 = vpop.permute.xlu1 %2095 }
 0x522   : > { %v1261_v7 = vsel %vm475_vm9, %v2103_v1, %v2058_v0  ;;  %1685 = vmatpush1.bf16.msra.mxu0 %v1684_v60  ;;  %v2098_v9 = vunpack.i.h.bf16 %v2096_v6  ;;  %v2097_v10 = vunpack.i.l.bf16 %v2096_v6  ;;  %1701 = vmatprep.subr.bf16.mxu1 %v2143_v27  ;;  %v1259_v14 = vsel %vm475_vm9, %v2088_v12, %v2102_v3  ;;  %v2125_v0 = vld [vmem:[#allocation2] sm:$0xff] }
 0x523   : > { %v2111_v15 = vpop.permute.xlu0 %2110  ;;  %v1260_v16 = vsel %vm475_vm9, %v2102_v3, %v2103_v1 }
 0x524   : > { %v2113_v17 = vunpack.i.h.bf16 %v2111_v15  ;;  %v2112_v18 = vunpack.i.l.bf16 %v2111_v15  ;;  %v1256_v19 = vsel %vm475_vm9, %v2087_v8, %v2097_v10  ;;  %v1258_v20 = vsel %vm475_vm9, %v2098_v9, %v2057_v4 }
 0x525   : > { %v1702_v24 = vpack.c.bf16 %v1261_v7, %v1258_v20  ;;  %v2106_v25 = vpop.permute.xlu1 %2105  ;;  %v1257_v28 = vsel %vm475_vm9, %v2097_v10, %v2098_v9  ;;  %v1688_v30 = vpack.c.bf16 %v1259_v14, %v1256_v19 }
 0x526   : > { %v1267_v29 = vsel %vm475_vm9, %v2113_v17, %v2063_v11  ;;  %v2108_v31 = vunpack.i.h.bf16 %v2106_v25  ;;  %v2107_v32 = vunpack.i.l.bf16 %v2106_v25  ;;  %v1265_v34 = vsel %vm475_vm9, %v2073_v5, %v2112_v18 }
 0x527   : > { %v2121_v36 = vpop.permute.xlu0 %2120  ;;  %v1686_v37 = vpack.c.bf16 %v1260_v16, %v1257_v28  ;;  %1703 = vmatpush3.bf16.msra.mxu1 %v1702_v24  ;;  %v1266_v22 = vsel %vm475_vm9, %v2112_v18, %v2113_v17 }
 0x528   : > { %v2123_v26 = vunpack.i.h.bf16 %v2121_v36  ;;  %v2122_v38 = vunpack.i.l.bf16 %v2121_v36  ;;  %v1262_v35 = vsel %vm475_vm9, %v2072_v13, %v2107_v32  ;;  %v1264_v41 = vsel %vm475_vm9, %v2108_v31, %v2062_v21  ;;  %1704 = vmatprep.subr.bf16.mxu1 %v2143_v27 }
 0x529   : > { %v1705_v44 = vpack.c.bf16 %v1267_v29, %v1264_v41  ;;  %1687 = vmatprep.subr.bf16.mxu0 %v1686_v37  ;;  %v2116_v45 = vpop.permute.xlu1 %2115  ;;  %v1263_v46 = vsel %vm475_vm9, %v2107_v32, %v2108_v31  ;;  %v1692_v48 = vpack.c.bf16 %v1265_v34, %v1262_v35 }
 0x52a   : > { %v1273_v47 = vsel %vm475_vm9, %v2123_v26, %v2068_v33  ;;  %1689 = vmatpush1.bf16.msra.mxu0 %v1688_v30  ;;  %v2118_v49 = vunpack.i.h.bf16 %v2116_v45  ;;  %v2117_v50 = vunpack.i.l.bf16 %v2116_v45  ;;  %v1271_v51 = vsel %vm475_vm9, %v2078_v23, %v2122_v38 }
 0x52b   : > { %v1247_v52 = vpop.permute.xlu0 %1246  ;;  %v1690_v53 = vpack.c.bf16 %v1266_v22, %v1263_v46  ;;  %1706 = vmatpush3.bf16.msra.mxu1 %v1705_v44  ;;  %v1272_v40 = vsel %vm475_vm9, %v2122_v38, %v2123_v26 }
 0x52c   : > { %v1268_v39 = vsel %vm475_vm9, %v2077_v43, %v2117_v50  ;;  %v1270_v54 = vsel %vm475_vm9, %v2118_v49, %v2067_v42  ;;  %1707 = vmatprep.subr.bf16.mxu1 %v2143_v27  ;;  %v1269_v55 = vsel %vm475_vm9, %v2117_v50, %v2118_v49  ;;  %v1171_v27 = vld [vmem:[%s2631_s6] sm:$0xff] }
 0x52d   : > { %v1708_v56 = vpack.c.bf16 %v1273_v47, %v1270_v54  ;;  %1691 = vmatprep.subr.bf16.mxu0 %v1690_v53  ;;  %v1245_v57 = vpop.permute.xlu1 %1244  ;;  %v1694_v58 = vpack.c.bf16 %v1272_v40, %v1269_v55  ;;  %v1696_v60 = vpack.c.bf16 %v1271_v51, %v1268_v39 }
 0x52e   : > { %1693 = vmatpush1.bf16.msra.mxu0 %v1692_v48  ;;  %v1275_v3 = vsel %vm475_vm9, %v1245_v57, %v1247_v52 }
 0x52f   : > { %v1249_v61 = vpop.permute.xlu0 %1248  ;;  %1695 = vmatprep.subr.bf16.mxu0 %v1694_v58  ;;  %1709 = vmatpush3.bf16.msra.mxu1 %v1708_v56 }
 0x530   : > { %v1276_v62 = vsel %vm475_vm9, %v1247_v52, %v1249_v61  ;;  %1621 = vmatprep.subr.mxu1 %v2125_v0 }
 0x531   : > { %v1243_v1 = vpop.permute.xlu1 %1242 }
 0x532   : > { %1697 = vmatpush1.bf16.msra.mxu0 %v1696_v60  ;;  %v1274_v4 = vsel %vm475_vm9, %v1243_v1, %v1245_v57 }
 0x533   : > { %1323 = vmatprep.subr.mxu0 %v1275_v3  ;;  %1622 = vmatpush3.msra.mxu1 %v1276_v62 }
 0x534   : > { %1624 = vmatmul.mubr.msk.f32.vlgmr.msra.gmra.mrb[4].mxu1 %vm530_vm10, %v1171_v27 }
 0x536   : > { %1324 = vmatpush1.msra.mxu0 %v1274_v4 }
 0x537   : > { %1529 = vmatmul.mubr.msk.f32.vlgmr.msra.gmra.mrb[4].mxu0 %vm530_vm10, %v1171_v27 }
 0x542   : > { %v1176_v5 = vpop.permute.xlu1 %1175 }
 0x607   : > { %v1444_v12 = vpop.f32.mrb[4].mxu1 }
 0x608   : > { %v1445_v6 = vadd.f32 %v1444_v12, %v1176_v5  ;;  %v1625_v7 = vpop.f32.mrb[5].mxu1 }
 0x60a   : > { %vm1450_vm0 = vcmp.ge.f32.partialorder %v1445_v6, 0.0  ;;  %v1453_v8 = vmul.f32 0.1, %v1445_v6  ;;  %v1373_v9 = vpop.f32.mrb[4].mxu0 }
 0x60b   : > { %v1374_v10 = vadd.f32 %v1373_v9, %v1176_v5  ;;  %v1375_v11 = vpop.f32.mrb[5].mxu0 }
 0x60c   : > { %v1456_v13 = vsel %vm1450_vm0, %v1445_v6, %v1453_v8  ;;  %v1376_v14 = vadd.f32 %v1375_v11, %v1176_v5 }
 0x60d   : > { %v1459_v15 = vmul.f32 %v1456_v13, %v2371_v59  ;;  %vm1448_vm1 = vcmp.ge.f32.partialorder %v1374_v10, 0.0  ;;  %v1451_v16 = vmul.f32 0.1, %v1374_v10 }
 0x60e   : > { %vm1449_vm2 = vcmp.ge.f32.partialorder %v1376_v14, 0.0  ;;  %v1452_v17 = vmul.f32 0.1, %v1376_v14 }
 0x60f   : > { %v1454_v18 = vsel %vm1448_vm1, %v1374_v10, %v1451_v16  ;;  %1462 = vst.msk [vmem:[%s305_s17 + $0x10] sm:$0xff] %vm707_vm11, %v1459_v15 }
 0x610   : > { %v1457_v19 = vmul.f32 %v1454_v18, %v2373_v63  ;;  %v1455_v20 = vsel %vm1449_vm2, %v1376_v14, %v1452_v17 }
 0x611   : > { %v1458_v21 = vmul.f32 %v1455_v20, %v2375_v2 }
 0x612   : > { %1460 = vst [vmem:[%s305_s17] sm:$0xff] %v1457_v19 }
 0x613   : > { %1461 = vst [vmem:[%s305_s17 + $0x8] sm:$0xff] %v1458_v21 }
 0x614 PF: > { %s18_s27 = sadd.s32 1, %s2132_s27  }
 0x615   : > { %p15_p4 = scmp.ge.s32.totalorder %s18_s27, 4  }
 0x617   :  { %17 = sbr.rel (!%p15_p4) target bundleno = 1 (0x1), region = 82 }

// kernel: direct_kernel_estimator.3
= control target key start
LH: loop header
LB: loop body
LE: loop exit
PB: predicated region body
PF: predicated region fallthrough
CT: control target
= control target key end

     0   :  { %s1913_s17 = smov 0   ;;  %s2158_s0 = inlined_call_operand.vmem [shape: f32[2,4,8,356], index: 0, kind: input, shape index: {}]   ;;  %s2159_s1 = inlined_call_operand.vmem [shape: f32[2,3,100], index: 1, kind: input, shape index: {}]   ;;  %s2160_s2 = inlined_call_operand.vmem [shape: f32[1,100], index: 2, kind: input, shape index: {}]   ;;  %s2161_s3 = inlined_call_operand.vmem [shape: f32[16,128], index: 3, kind: input, shape index: {}]   ;;  %s2162_s4 = inlined_call_operand.vmem [shape: f32[16,1], index: 4, kind: input, shape index: {}]   ;;  %s2163_s5 = inlined_call_operand.vmem [shape: f32[16,144], index: 5, kind: input, shape index: {}]   ;;  %s2164_s6 = inlined_call_operand.vmem [shape: f32[16,1], index: 6, kind: input, shape index: {}]   ;;  %s2165_s7 = inlined_call_operand.vmem [shape: f32[8,144], index: 7, kind: input, shape index: {}]   ;;  %s2166_s8 = inlined_call_operand.vmem [shape: f32[8,1], index: 8, kind: input, shape index: {}]   ;;  %s2167_s9 = inlined_call_operand.vmem [shape: f32[3,8], index: 9, kind: input, shape index: {}]   ;;  %s2168_s10 = inlined_call_operand.vmem [shape: f32[3,1], index: 10, kind: input, shape index: {}]   ;;  %s2169_s11 = inlined_call_operand.vmem [shape: f32[2,3,100], index: 11, kind: output, shape index: {}]  }
   0x1 LB: > { %s1291_s18 = sadd.s32 4294967295, %s1838_s17   ;;  %p1295_p0 = scmp.ge.s32.totalorder %s1838_s17, 1  ;;  %s1838_s17 = sphi %s1913_s17, %s21_s17  }
   0x2   : > { %p346_p1 = scmp.lt.s32.totalorder %s1838_s17, 3 }
   0x4   : > { %p347_p2 = pnand %p1295_p0, %p346_p1 }
   0x5   : > { %p389_p3 = scmp.lt.s32.totalorder (!%p347_p2), %s1291_s18, 1  ;;  %s1840_s23 = smov (!%p347_p2), 117   ;;  %vm420_vm0 = vcmask (!%p347_p2), 1039360   ;;  %vm426_vm1 = vcmask (!%p347_p2), 965632   ;;  %v472_v60 = vld [vmem:[%s2161_s3] sm:$0xff] (!%p347_p2)  ;;  %v1844_v61 = vmov (!%p347_p2), 0  }
   0x6   : > { %350 = sbr.rel (%p347_p2) target bundleno = 1734 (0x6c6), region = 64  ;;  %s1841_s24 = smov (!%p347_p2), 127   ;;  %1364 = vmatprep.mubr.f32.mxu0 (!%p347_p2), %v472_v60  ;;  %1591 = vset.pattern.permute.xlu1 (!%p347_p2), %v1844_v61  ;;  %v475_v62 = vld [vmem:[%s2162_s4 + $0x8] sm:$0xff] (!%p347_p2)  ;;  %v474_v63 = vld [vmem:[%s2162_s4] sm:$0xff] (!%p347_p2)  ;;  %vm542_vm2 = vcmask (!%p347_p2), 89088   ;;  %vm662_vm3 = vcmask (!%p347_p2), 818176  }
   0x7   : > { %s1842_s25 = smov (!%p347_p2), 118   ;;  %s1843_s26 = smov (!%p347_p2), 11   ;;  %1590 = vset.pattern.permute.xlu0 (!%p347_p2), %v1844_v61  ;;  %vm695_vm6 = vcmask (!%p347_p2), 1031168   ;;  %vm822_vm7 = vcmask (!%p347_p2), 130048   ;;  %vm1852_vm10 = vmmov (!%p347_p2), 0   ;;  %vm1148_vm12 = vcmask (!%p347_p2), 64512  }
   0x8   : > { %s1846_s20 = smov (!%p347_p2), 126   ;;  %s1847_s21 = smov (!%p347_p2), 116   ;;  %vm1224_vm13 = vcmask (!%p347_p2), 813056  }
   0x9   : > { %s1850_s27 = smov (!%p347_p2), 108   ;;  %s1851_s28 = smov (!%p347_p2), 106  }
   0xd   : > { %s2171_s18 = smov (!%p389_p3, %s1291_s18), 1 }
   0xe   : > { %s1458_s19 = smul.u32 96, %s2171_s18  ;;  %s1297_s15 = sshll.u32 %s2171_s18, 2 }
   0xf   : > { %s397_s29 = scalar_lea.vmem %s2159_s1, %s1297_s15  ;;  %s401_s13 = scalar_lea.vmem %s2169_s11, %s1297_s15 }
  0x10   : > { %s393_s22 = scalar_lea.vmem %s2158_s0, %s1458_s19 }
  0x11   : > { %v403_v0 = vld [vmem:[%s393_s22] sm:$0xff]  ;;  %v404_v1 = vld [vmem:[%s393_s22 + $0x8] sm:$0xff]  ;;  %v1299_v2 = vld [vmem:[%s393_s22 + $0x18] sm:$0xff] }
  0x12   : > { %v1480_v3 = vpack.i.bf16 %v404_v1, %v403_v0  ;;  %428 = vrot.lane.b32.xlu1 %v404_v1, %s1840_s23  ;;  %v1300_v4 = vld [vmem:[%s393_s22 + $0x20] sm:$0xff]  ;;  %v1301_v6 = vld [vmem:[%s393_s22 + $0x30] sm:$0xff]  ;;  %v1302_v7 = vld [vmem:[%s393_s22 + $0x38] sm:$0xff] }
  0x13   : > { %v1490_v5 = vpack.i.bf16 %v1300_v4, %v1299_v2  ;;  %v1555_v8 = vpack.i.bf16 %v1302_v7, %v1301_v6  ;;  %v1932_v9 = vld [vmem:[%s393_s22 + $0x48] sm:$0xff]  ;;  %v1934_v10 = vld [vmem:[%s393_s22 + $0x50] sm:$0xff]  ;;  %s1849_s22 = smov 107  }
  0x14   : > { %1481 = vrot.lane.b32.xlu0 %v1480_v3, %s1841_s24  ;;  %v1510_v11 = vpack.i.bf16 %v1934_v10, %v1932_v9 }
  0x16   : > { %1491 = vrot.lane.b32.xlu1 %v1490_v5, %s1841_s24 }
  0x18   : > { %1486 = vrot.lane.b32.xlu0 %v1480_v3, %s1842_s25 }
  0x1a   : > { %442 = vrot.lane.b32.xlu1 %v1300_v4, %s1840_s23 }
  0x1c   : > { %1496 = vrot.lane.b32.xlu0 %v1490_v5, %s1842_s25 }
  0x1e   : > { %1506 = vrot.lane.b32.xlu1 %v1555_v8, %s1842_s25 }
  0x20   : > { %1501 = vrot.lane.b32.xlu0 %v1555_v8, %s1841_s24 }
  0x22   : > { %1511 = vrot.lane.b32.xlu1 %v1510_v11, %s1841_s24 }
  0x24   : > { %456 = vrot.lane.b32.xlu0 %v1302_v7, %s1840_s23 }
  0x26   : > { %470 = vrot.lane.b32.xlu1 %v1934_v10, %s1840_s23 }
  0x28   : > { %1516 = vrot.lane.b32.xlu0 %v1510_v11, %s1842_s25 }
  0x2c   : > { %1521 = vrot.lane.b32.xlu0 %v1480_v3, %s1843_s26 }
  0x84   : > { %v429_v12 = vpop.permute.xlu1 %428 }
  0x85   : > { %v1530_v27 = vpack.i.bf16 %v1299_v2, %v429_v12 }
  0x86   : > { %v1482_v13 = vpop.permute.xlu0 %1481 }
  0x87   : > { %v1484_v14 = vunpack.i.h.bf16 %v1482_v13  ;;  %v1483_v15 = vunpack.i.l.bf16 %v1482_v13 }
  0x88   : > { %v1492_v16 = vpop.permute.xlu1 %1491 }
  0x89   : > { %v421_v17 = vsel %vm420_vm0, %v1483_v15, %v1484_v14  ;;  %v1494_v18 = vunpack.i.h.bf16 %v1492_v16  ;;  %v1493_v19 = vunpack.i.l.bf16 %v1492_v16 }
  0x8a   : > { %v1525_v20 = vpack.i.bf16 %v1484_v14, %v421_v17  ;;  %v1487_v21 = vpop.permute.xlu0 %1486 }
  0x8b   : > { %v1489_v22 = vunpack.i.h.bf16 %v1487_v21  ;;  %v1488_v23 = vunpack.i.l.bf16 %v1487_v21  ;;  %v436_v26 = vsel %vm420_vm0, %v1493_v19, %v1494_v18 }
  0x8c   : > { %1526 = vrot.lane.b32.xlu1 %v1525_v20, %s1843_s26  ;;  %v443_v24 = vpop.permute.xlu1 %442  ;;  %v1540_v32 = vpack.i.bf16 %v436_v26, %v1300_v4 }
  0x8d   : > { %v427_v25 = vsel %vm426_vm1, %v1488_v23, %v1489_v22 }
  0x8e   : > { %v1535_v28 = vpack.i.bf16 %v1489_v22, %v427_v25  ;;  %v1497_v29 = vpop.permute.xlu0 %1496 }
  0x8f   : > { %v1499_v30 = vunpack.i.h.bf16 %v1497_v29  ;;  %v1498_v31 = vunpack.i.l.bf16 %v1497_v29 }
  0x90   : > { %1536 = vrot.lane.b32.xlu0 %v1535_v28, %s1843_s26  ;;  %1531 = vrot.lane.b32.xlu1 %v1530_v27, %s1843_s26  ;;  %v1507_v33 = vpop.permute.xlu1 %1506 }
  0x91   : > { %v441_v34 = vsel %vm426_vm1, %v1498_v31, %v1499_v30  ;;  %v1509_v35 = vunpack.i.h.bf16 %v1507_v33  ;;  %v1508_v36 = vunpack.i.l.bf16 %v1507_v33  ;;  %v1550_v46 = vpack.i.bf16 %v443_v24, %v1499_v30 }
  0x92   : > { %v1545_v37 = vpack.i.bf16 %v441_v34, %v1494_v18  ;;  %v1502_v38 = vpop.permute.xlu0 %1501 }
  0x93   : > { %v1504_v39 = vunpack.i.h.bf16 %v1502_v38  ;;  %v1503_v40 = vunpack.i.l.bf16 %v1502_v38  ;;  %v455_v43 = vsel %vm426_vm1, %v1508_v36, %v1509_v35 }
  0x94   : > { %1541 = vrot.lane.b32.xlu0 %v1540_v32, %s1843_s26  ;;  %1546 = vrot.lane.b32.xlu1 %v1545_v37, %s1843_s26  ;;  %v1512_v41 = vpop.permute.xlu1 %1511  ;;  %v1570_v49 = vpack.i.bf16 %v1509_v35, %v455_v43 }
  0x95   : > { %v450_v42 = vsel %vm420_vm0, %v1503_v40, %v1504_v39  ;;  %v1514_v44 = vunpack.i.h.bf16 %v1512_v41  ;;  %v1513_v45 = vunpack.i.l.bf16 %v1512_v41 }
  0x96   : > { %v457_v47 = vpop.permute.xlu0 %456  ;;  %v1560_v48 = vpack.i.bf16 %v1504_v39, %v450_v42 }
  0x97   : > { %v464_v50 = vsel %vm420_vm0, %v1513_v45, %v1514_v44  ;;  %v1565_v57 = vpack.i.bf16 %v1932_v9, %v457_v47 }
  0x98   : > { %1551 = vrot.lane.b32.xlu0 %v1550_v46, %s1843_s26  ;;  %1556 = vrot.lane.b32.xlu1 %v1555_v8, %s1843_s26  ;;  %v1575_v54 = vpack.i.bf16 %v464_v50, %v1934_v10  ;;  %v471_v55 = vpop.permute.xlu1 %470 }
  0x9a   : > { %v1517_v51 = vpop.permute.xlu0 %1516 }
  0x9b   : > { %v1519_v52 = vunpack.i.h.bf16 %v1517_v51  ;;  %v1518_v53 = vunpack.i.l.bf16 %v1517_v51 }
  0x9c   : > { %1561 = vrot.lane.b32.xlu0 %v1560_v48, %s1843_s26  ;;  %1571 = vrot.lane.b32.xlu1 %v1570_v49, %s1843_s26 }
  0x9d   : > { %v469_v56 = vsel %vm426_vm1, %v1518_v53, %v1519_v52  ;;  %v1585_v58 = vpack.i.bf16 %v471_v55, %v1519_v52 }
  0x9e   : > { %v1580_v59 = vpack.i.bf16 %v469_v56, %v1514_v44  ;;  %v1522_v0 = vpop.permute.xlu0 %1521 }
  0x9f   : > { %v1524_v1 = vunpack.i.h.bf16 %v1522_v0  ;;  %v1523_v2 = vunpack.i.l.bf16 %v1522_v0 }
  0xa0   : > { %1566 = vrot.lane.b32.xlu0 %v1565_v57, %s1843_s26  ;;  %1576 = vrot.lane.b32.xlu1 %v1575_v54, %s1843_s26 }
  0xa1   : > { %v543_v6 = vsel %vm542_vm2, %v1523_v2, %v1524_v1 }
  0xa4   : > { %1581 = vrot.lane.b32.xlu0 %v1580_v59, %s1843_s26  ;;  %1586 = vrot.lane.b32.xlu1 %v1585_v58, %s1843_s26 }
  0xa8   : > { %483 = vperm.xlu1 %1591, %v475_v62   ;;  %478 = vperm.xlu0 %1590, %v474_v63   ;;  %v473_v62 = vld [vmem:[%s2161_s3 + $0x8] sm:$0xff]  ;;  %v1845_v63 = vmov 0.0  }
  0xa9   : > { %665 = vst [vmem:[#allocation2 + $0x20] sm:$0xff] %v1845_v63  ;;  %661 = vst [vmem:[#allocation2 + $0x8] sm:$0xff] %v1845_v63 }
  0xaa   : > { %913 = vst [vmem:[#allocation3 + $0x8] sm:$0xff] %v1845_v63  ;;  %916 = vst [vmem:[#allocation3 + $0x20] sm:$0xff] %v1845_v63 }
  0xfe   : > { %v1527_v3 = vpop.permute.xlu1 %1526 }
  0xff   : > { %v1529_v4 = vunpack.i.h.bf16 %v1527_v3  ;;  %v1528_v5 = vunpack.i.l.bf16 %v1527_v3 }
 0x101   : > { %v544_v7 = vsel %vm542_vm2, %v1528_v5, %v1529_v4 }
 0x102   : > { %v1537_v8 = vpop.permute.xlu0 %1536  ;;  %v1532_v9 = vpop.permute.xlu1 %1531  ;;  %v1372_v10 = vpack.c.bf16 %v544_v7, %v543_v6  ;;  %v2001_v6 = vld [vmem:[%s2160_s2] ss:$0 sm:$0xff] }
 0x103   : > { %v1539_v11 = vunpack.i.h.bf16 %v1537_v8  ;;  %v1538_v12 = vunpack.i.l.bf16 %v1537_v8  ;;  %v1533_v13 = vunpack.i.l.bf16 %v1532_v9  ;;  %v1534_v18 = vunpack.i.h.bf16 %v1532_v9 }
 0x104   : > { %1373 = vmatprep.subr.bf16.mxu0 %v1372_v10 }
 0x105   : > { %v545_v14 = vsel %vm542_vm2, %v1538_v12, %v1539_v11  ;;  %1375 = vmatpush3.bf16.msra.mxu0 %v1372_v10 }
 0x106   : > { %v1376_v15 = vpack.c.bf16 %v1533_v13, %v545_v14  ;;  %v1542_v16 = vpop.permute.xlu0 %1541  ;;  %v1547_v17 = vpop.permute.xlu1 %1546 }
 0x107   : > { %v1544_v19 = vunpack.i.h.bf16 %v1542_v16  ;;  %v1543_v20 = vunpack.i.l.bf16 %v1542_v16  ;;  %v1548_v21 = vunpack.i.l.bf16 %v1547_v17  ;;  %v1549_v24 = vunpack.i.h.bf16 %v1547_v17 }
 0x108   : > { %1377 = vmatprep.subr.bf16.mxu0 %v1376_v15 }
 0x109   : > { %1379 = vmatpush3.bf16.msra.mxu0 %v1376_v15  ;;  %v546_v22 = vsel %vm542_vm2, %v1534_v18, %v1543_v20  ;;  %v547_v23 = vsel %vm542_vm2, %v1544_v19, %v1548_v21  ;;  %v1848_v18 = vmov 0.0|0.0  }
 0x10a   : > { %v1552_v25 = vpop.permute.xlu0 %1551  ;;  %v1557_v26 = vpop.permute.xlu1 %1556  ;;  %v1380_v27 = vpack.c.bf16 %v547_v23, %v546_v22  ;;  %1404 = vmatprep.subr.bf16.mxu1 %v1848_v18 }
 0x10b   : > { %v1554_v28 = vunpack.i.h.bf16 %v1552_v25  ;;  %v1553_v29 = vunpack.i.l.bf16 %v1552_v25  ;;  %v1559_v30 = vunpack.i.h.bf16 %v1557_v26  ;;  %v1558_v31 = vunpack.i.l.bf16 %v1557_v26 }
 0x10c   : > { %1381 = vmatprep.subr.bf16.mxu0 %v1380_v27 }
 0x10d   : > { %v548_v32 = vsel %vm542_vm2, %v1549_v24, %v1553_v29  ;;  %1383 = vmatpush3.bf16.msra.mxu0 %v1380_v27  ;;  %v549_v36 = vsel %vm542_vm2, %v1558_v31, %v1559_v30 }
 0x10e   : > { %v1384_v33 = vpack.c.bf16 %v1554_v28, %v548_v32  ;;  %v1562_v34 = vpop.permute.xlu0 %1561  ;;  %v1572_v35 = vpop.permute.xlu1 %1571 }
 0x10f   : > { %v1564_v37 = vunpack.i.h.bf16 %v1562_v34  ;;  %v1563_v38 = vunpack.i.l.bf16 %v1562_v34  ;;  %v1574_v39 = vunpack.i.h.bf16 %v1572_v35  ;;  %v1573_v40 = vunpack.i.l.bf16 %v1572_v35 }
 0x110   : > { %1385 = vmatprep.subr.bf16.mxu0 %v1384_v33 }
 0x111   : > { %1387 = vmatpush3.bf16.msra.mxu0 %v1384_v33  ;;  %v550_v41 = vsel %vm542_vm2, %v1563_v38, %v1564_v37  ;;  %v551_v43 = vsel %vm542_vm2, %v1573_v40, %v1574_v39 }
 0x112   : > { %v1567_v42 = vpop.permute.xlu0 %1566  ;;  %v1577_v44 = vpop.permute.xlu1 %1576  ;;  %v1388_v45 = vpack.c.bf16 %v550_v41, %v549_v36 }
 0x113   : > { %v1568_v46 = vunpack.i.l.bf16 %v1567_v42  ;;  %v1569_v47 = vunpack.i.h.bf16 %v1567_v42  ;;  %v1579_v49 = vunpack.i.h.bf16 %v1577_v44  ;;  %v1578_v50 = vunpack.i.l.bf16 %v1577_v44 }
 0x114   : > { %1389 = vmatprep.subr.bf16.mxu0 %v1388_v45 }
 0x115   : > { %v1392_v48 = vpack.c.bf16 %v1568_v46, %v551_v43  ;;  %1391 = vmatpush3.bf16.msra.mxu0 %v1388_v45  ;;  %v552_v58 = vsel %vm542_vm2, %v1569_v47, %v1578_v50 }
 0x116   : > { %v1582_v51 = vpop.permute.xlu0 %1581  ;;  %v1587_v52 = vpop.permute.xlu1 %1586 }
 0x117   : > { %v1584_v53 = vunpack.i.h.bf16 %v1582_v51  ;;  %v1583_v54 = vunpack.i.l.bf16 %v1582_v51  ;;  %v1588_v55 = vunpack.i.l.bf16 %v1587_v52  ;;  %1393 = vmatprep.subr.bf16.mxu0 %v1392_v48  ;;  %v1589_v56 = vunpack.i.h.bf16 %v1587_v52 }
 0x119   : > { %v554_v57 = vsel %vm542_vm2, %v1584_v53, %v1588_v55  ;;  %1395 = vmatpush3.bf16.msra.mxu0 %v1392_v48  ;;  %v553_v59 = vsel %vm542_vm2, %v1579_v49, %v1583_v54  ;;  %v732_v55 = vld [vmem:[%s2164_s6] sm:$0xff] }
 0x11a   : > { %v1396_v60 = vpack.c.bf16 %v553_v59, %v552_v58  ;;  %v1400_v61 = vpack.c.bf16 %v1589_v56, %v554_v57 }
 0x11c   : > { %1397 = vmatprep.subr.bf16.mxu0 %v1396_v60 }
 0x11d   : > { %1399 = vmatpush3.bf16.msra.mxu0 %v1396_v60 }
 0x11e   : > { %1401 = vmatprep.subr.bf16.mxu0 %v1400_v61 }
 0x121   : > { %1403 = vmatpush3.bf16.msra.mxu0 %v1400_v61  ;;  %v729_v61 = vld [vmem:[%s2163_s5 + $0x8] sm:$0xff] }
 0x122   : > { %1431 = vmatprep.subr.bf16.mxu0 %v1848_v18  ;;  %1306 = vmatprep.mubr.msk.f32.mxu1 %vm822_vm7, %v729_v61 }
 0x124   : > { %1365 = vmatmul.mubr.f32.vlgmr.msra.gmra.mrb[0].mxu0 %v473_v62 }
 0x127   : > { %v484_v0 = vpop.permute.xlu1 %483  ;;  %v479_v1 = vpop.permute.xlu0 %478 }
 0x1f7   : > { %v1366_v2 = vpop.f32.mrb[0].mxu0 }
 0x1f8   : > { %v643_v3 = vadd.f32 %v1366_v2, %v484_v0  ;;  %v637_v4 = vpop.f32.mrb[1].mxu0 }
 0x1f9   : > { %v638_v5 = vadd.f32 %v637_v4, %v479_v1  ;;  %v733_v1 = vld [vmem:[%s2164_s6 + $0x8] sm:$0xff] }
 0x1fa   : > { %vm647_vm4 = vcmp.ge.f32.partialorder %v643_v3, 0.0  ;;  %v649_v7 = vmul.f32 0.1, %v643_v3 }
 0x1fb   : > { %vm646_vm5 = vcmp.ge.f32.partialorder %v638_v5, 0.0  ;;  %v648_v8 = vmul.f32 0.1, %v638_v5 }
 0x1fc   : > { %v651_v9 = vsel %vm647_vm4, %v643_v3, %v649_v7 }
 0x1fd   : > { %v659_v10 = vmul.f32 %v2001_v6, %v651_v9  ;;  %v650_v11 = vsel %vm646_vm5, %v638_v5, %v648_v8 }
 0x1fe   : > { %v658_v12 = vmul.f32 %v2001_v6, %v650_v11 }
 0x1ff   : > { %668 = vst.msk [vmem:[#allocation2 + $0x20] sm:$0xff] %vm662_vm3, %v659_v10 }
 0x200   : > { %667 = vst.msk [vmem:[#allocation2 + $0x8] sm:$0xff] %vm662_vm3, %v658_v12 }
 0x206   : > { %v672_v13 = vld [vmem:[#allocation2 + $0x20] sm:$0xff] }
 0x207   : > { %v1592_v14 = vpack.i.bf16 %v672_v13, %v1845_v63  ;;  %v670_v15 = vld [vmem:[#allocation2 + $0x8] sm:$0xff] }
 0x208   : > { %v1602_v16 = vpack.i.bf16 %v670_v15, %v1845_v63  ;;  %v1627_v17 = vpack.i.bf16 %v672_v13, %v670_v15 }
 0x209   : > { %1593 = vrot.lane.b32.xlu0 %v1592_v14, %s1841_s24 }
 0x20a   : > { %1603 = vrot.lane.b32.xlu1 %v1602_v16, %s1841_s24 }
 0x20d   : > { %1598 = vrot.lane.b32.xlu0 %v1592_v14, %s1846_s20 }
 0x20e   : > { %1608 = vrot.lane.b32.xlu1 %v1602_v16, %s1846_s20 }
 0x211   : > { %1618 = vrot.lane.b32.xlu0 %v1592_v14, %s1842_s25 }
 0x212   : > { %1613 = vrot.lane.b32.xlu1 %v1602_v16, %s1842_s25 }
 0x215   : > { %1628 = vrot.lane.b32.xlu0 %v1627_v17, %s1847_s21 }
 0x216   : > { %1623 = vrot.lane.b32.xlu1 %v1627_v17, %s1840_s23 }
 0x219   : > { %1638 = vrot.lane.b32.xlu0 %v1627_v17, %s1849_s22 }
 0x21a   : > { %1633 = vrot.lane.b32.xlu1 %v1627_v17, %s1850_s27 }
 0x21d   : > { %1653 = vrot.lane.b32.xlu0 %v1602_v16, %s1843_s26 }
 0x21e   : > { %1643 = vrot.lane.b32.xlu1 %v1627_v17, %s1851_s28 }
 0x222   : > { %1648 = vrot.lane.b32.xlu1 %v1592_v14, %s1843_s26 }
 0x27b   : > { %v1594_v19 = vpop.permute.xlu0 %1593 }
 0x27c   : > { %v1596_v20 = vunpack.i.h.bf16 %v1594_v19  ;;  %v1595_v21 = vunpack.i.l.bf16 %v1594_v19  ;;  %v1604_v22 = vpop.permute.xlu1 %1603 }
 0x27d   : > { %v1606_v23 = vunpack.i.h.bf16 %v1604_v22  ;;  %v1605_v24 = vunpack.i.l.bf16 %v1604_v22 }
 0x27e   : > { %v686_v25 = vsel %vm420_vm0, %v1595_v21, %v1596_v20 }
 0x27f   : > { %v1657_v26 = vpack.i.bf16 %v1596_v20, %v686_v25  ;;  %v685_v27 = vsel %vm420_vm0, %v1605_v24, %v1606_v23  ;;  %v1599_v28 = vpop.permute.xlu0 %1598 }
 0x280   : > { %v1667_v29 = vpack.i.bf16 %v1606_v23, %v685_v27  ;;  %v1601_v30 = vunpack.i.h.bf16 %v1599_v28  ;;  %v1600_v31 = vunpack.i.l.bf16 %v1599_v28  ;;  %v1609_v32 = vpop.permute.xlu1 %1608 }
 0x281   : > { %v1611_v33 = vunpack.i.h.bf16 %v1609_v32  ;;  %v1610_v34 = vunpack.i.l.bf16 %v1609_v32  ;;  %1658 = vrot.lane.b32.xlu1 %v1657_v26, %s1843_s26 }
 0x282   : > { %v697_v35 = vsel %vm695_vm6, %v1600_v31, %v1601_v30  ;;  %1668 = vrot.lane.b32.xlu0 %v1667_v29, %s1843_s26 }
 0x283   : > { %v1662_v36 = vpack.i.bf16 %v1601_v30, %v697_v35  ;;  %v696_v37 = vsel %vm695_vm6, %v1610_v34, %v1611_v33  ;;  %v1619_v38 = vpop.permute.xlu0 %1618 }
 0x284   : > { %v1672_v39 = vpack.i.bf16 %v1611_v33, %v696_v37  ;;  %v1621_v40 = vunpack.i.h.bf16 %v1619_v38  ;;  %v1620_v41 = vunpack.i.l.bf16 %v1619_v38  ;;  %v1614_v42 = vpop.permute.xlu1 %1613 }
 0x285   : > { %v1616_v43 = vunpack.i.h.bf16 %v1614_v42  ;;  %v1615_v44 = vunpack.i.l.bf16 %v1614_v42  ;;  %1663 = vrot.lane.b32.xlu1 %v1662_v36, %s1843_s26 }
 0x286   : > { %v707_v45 = vsel %vm426_vm1, %v1620_v41, %v1621_v40  ;;  %1673 = vrot.lane.b32.xlu0 %v1672_v39, %s1843_s26 }
 0x287   : > { %v1682_v46 = vpack.i.bf16 %v1621_v40, %v707_v45  ;;  %v706_v47 = vsel %vm426_vm1, %v1615_v44, %v1616_v43  ;;  %v1629_v48 = vpop.permute.xlu0 %1628 }
 0x288   : > { %v1677_v49 = vpack.i.bf16 %v1616_v43, %v706_v47  ;;  %v1624_v50 = vpop.permute.xlu1 %1623 }
 0x289   : > { %1683 = vrot.lane.b32.xlu1 %v1682_v46, %s1843_s26 }
 0x28a   : > { %1678 = vrot.lane.b32.xlu0 %v1677_v49, %s1843_s26 }
 0x28b   : > { %v1639_v51 = vpop.permute.xlu0 %1638 }
 0x28c   : > { %v1634_v52 = vpop.permute.xlu1 %1633 }
 0x28d   : > { %1693 = vrot.lane.b32.xlu1 %v1629_v48, %s1843_s26 }
 0x28e   : > { %1688 = vrot.lane.b32.xlu0 %v1624_v50, %s1843_s26 }
 0x28f   : > { %v1654_v53 = vpop.permute.xlu0 %1653 }
 0x290   : > { %v1644_v54 = vpop.permute.xlu1 %1643  ;;  %v1656_v56 = vunpack.i.h.bf16 %v1654_v53  ;;  %v1655_v57 = vunpack.i.l.bf16 %v1654_v53  ;;  %v731_v53 = vld [vmem:[%s2163_s5 + $0x18] sm:$0xff] }
 0x291   : > { %1703 = vrot.lane.b32.xlu1 %v1639_v51, %s1843_s26 }
 0x292   : > { %1698 = vrot.lane.b32.xlu0 %v1634_v52, %s1843_s26  ;;  %v796_v62 = vsel %vm542_vm2, %v1655_v57, %v1656_v56  ;;  %v728_v52 = vld [vmem:[%s2163_s5] sm:$0xff] }
 0x294   : > { %v1649_v58 = vpop.permute.xlu1 %1648 }
 0x295   : > { %v1651_v59 = vunpack.i.h.bf16 %v1649_v58  ;;  %v1650_v60 = vunpack.i.l.bf16 %v1649_v58  ;;  %736 = vperm.xlu1 %1591, %v732_v55  }
 0x296   : > { %1708 = vrot.lane.b32.xlu0 %v1644_v54, %s1843_s26  ;;  %v730_v54 = vld [vmem:[%s2163_s5 + $0x10] sm:$0xff] }
 0x297   : > { %v797_v0 = vsel %vm542_vm2, %v1650_v60, %v1651_v59 }
 0x298   : > { %v1405_v2 = vpack.c.bf16 %v797_v0, %v796_v62 }
 0x29a   : > { %1406 = vmatpush1.bf16.msra.mxu1 %v1405_v2  ;;  %741 = vperm.xlu0 %1590, %v733_v1  }
 0x29b   : > { %1407 = vmatprep.subr.bf16.mxu1 %v1848_v18 }
 0x2f3   : > { %v1659_v3 = vpop.permute.xlu1 %1658 }
 0x2f4   : > { %v1661_v4 = vunpack.i.h.bf16 %v1659_v3  ;;  %v1660_v5 = vunpack.i.l.bf16 %v1659_v3  ;;  %v1669_v7 = vpop.permute.xlu0 %1668 }
 0x2f5   : > { %v1671_v8 = vunpack.i.h.bf16 %v1669_v7  ;;  %v1670_v9 = vunpack.i.l.bf16 %v1669_v7 }
 0x2f6   : > { %v799_v10 = vsel %vm542_vm2, %v1660_v5, %v1661_v4 }
 0x2f7   : > { %v1664_v11 = vpop.permute.xlu1 %1663  ;;  %v798_v12 = vsel %vm542_vm2, %v1670_v9, %v1671_v8 }
 0x2f8   : > { %v1666_v13 = vunpack.i.h.bf16 %v1664_v11  ;;  %v1665_v14 = vunpack.i.l.bf16 %v1664_v11  ;;  %v1674_v15 = vpop.permute.xlu0 %1673  ;;  %v1408_v16 = vpack.c.bf16 %v799_v10, %v798_v12 }
 0x2f9   : > { %v1676_v17 = vunpack.i.h.bf16 %v1674_v15  ;;  %v1675_v19 = vunpack.i.l.bf16 %v1674_v15 }
 0x2fa   : > { %1409 = vmatpush1.bf16.msra.mxu1 %v1408_v16  ;;  %v801_v20 = vsel %vm542_vm2, %v1665_v14, %v1666_v13 }
 0x2fb   : > { %v1684_v21 = vpop.permute.xlu1 %1683  ;;  %1410 = vmatprep.subr.bf16.mxu1 %v1848_v18  ;;  %v800_v22 = vsel %vm542_vm2, %v1675_v19, %v1676_v17 }
 0x2fc   : > { %v1686_v23 = vunpack.i.h.bf16 %v1684_v21  ;;  %v1685_v24 = vunpack.i.l.bf16 %v1684_v21  ;;  %v1679_v25 = vpop.permute.xlu0 %1678  ;;  %v1411_v26 = vpack.c.bf16 %v801_v20, %v800_v22 }
 0x2fd   : > { %v1681_v27 = vunpack.i.h.bf16 %v1679_v25  ;;  %v1680_v28 = vunpack.i.l.bf16 %v1679_v25 }
 0x2fe   : > { %1412 = vmatpush1.bf16.msra.mxu1 %v1411_v26  ;;  %v803_v29 = vsel %vm542_vm2, %v1685_v24, %v1686_v23 }
 0x2ff   : > { %1413 = vmatprep.subr.bf16.mxu1 %v1848_v18  ;;  %v802_v30 = vsel %vm542_vm2, %v1680_v28, %v1681_v27  ;;  %v1694_v33 = vpop.permute.xlu1 %1693 }
 0x300   : > { %v1689_v31 = vpop.permute.xlu0 %1688  ;;  %v1414_v32 = vpack.c.bf16 %v803_v29, %v802_v30  ;;  %v1696_v37 = vunpack.i.h.bf16 %v1694_v33  ;;  %v1695_v38 = vunpack.i.l.bf16 %v1694_v33 }
 0x301   : > { %v1691_v34 = vunpack.i.h.bf16 %v1689_v31  ;;  %v1690_v35 = vunpack.i.l.bf16 %v1689_v31 }
 0x302   : > { %1415 = vmatpush1.bf16.msra.mxu1 %v1414_v32  ;;  %v1420_v40 = vpack.c.bf16 %v1696_v37, %v1695_v38 }
 0x303   : > { %v1417_v36 = vpack.c.bf16 %v1691_v34, %v1690_v35  ;;  %1416 = vmatprep.subr.bf16.mxu1 %v1848_v18  ;;  %v1704_v43 = vpop.permute.xlu1 %1703 }
 0x304   : > { %v1699_v39 = vpop.permute.xlu0 %1698  ;;  %v1706_v44 = vunpack.i.h.bf16 %v1704_v43  ;;  %v1705_v45 = vunpack.i.l.bf16 %v1704_v43 }
 0x305   : > { %v1701_v41 = vunpack.i.h.bf16 %v1699_v39  ;;  %v1700_v42 = vunpack.i.l.bf16 %v1699_v39 }
 0x306   : > { %1418 = vmatpush1.bf16.msra.mxu1 %v1417_v36  ;;  %v1426_v48 = vpack.c.bf16 %v1706_v44, %v1705_v45 }
 0x307   : > { %1419 = vmatprep.subr.bf16.mxu1 %v1848_v18  ;;  %v1423_v46 = vpack.c.bf16 %v1701_v41, %v1700_v42 }
 0x308   : > { %v1709_v47 = vpop.permute.xlu0 %1708 }
 0x309   : > { %v1711_v49 = vunpack.i.h.bf16 %v1709_v47  ;;  %v1710_v50 = vunpack.i.l.bf16 %v1709_v47 }
 0x30a   : > { %1421 = vmatpush1.bf16.msra.mxu1 %v1420_v40 }
 0x30b   : > { %1422 = vmatprep.subr.bf16.mxu1 %v1848_v18  ;;  %v1429_v51 = vpack.c.bf16 %v1711_v49, %v1710_v50 }
 0x30e   : > { %1424 = vmatpush1.bf16.msra.mxu1 %v1423_v46 }
 0x30f   : > { %1425 = vmatprep.subr.bf16.mxu1 %v1848_v18 }
 0x312   : > { %1427 = vmatpush1.bf16.msra.mxu1 %v1426_v48 }
 0x313   : > { %1428 = vmatprep.subr.bf16.mxu1 %v1848_v18 }
 0x314   : > { %v737_v55 = vpop.permute.xlu1 %736 }
 0x316   : > { %1430 = vmatpush1.bf16.msra.mxu1 %v1429_v51 }
 0x317   : > { %1367 = vmatprep.subr.mxu1 %v1845_v63 }
 0x319   : > { %894 = vmatmul.mubr.f32.vlgmr.msra.gmra.mrb[0].mxu1 %v728_v52  ;;  %v742_v60 = vpop.permute.xlu0 %741 }
 0x31a   : > { %1307 = vmatprep.mubr.msk.f32.mxu1 %vm822_vm7, %v731_v53 }
 0x31d   : > { %899 = vmatmul.mubr.f32.gmra.mrb[2].mxu1 %v730_v54 }
 0x31e   : > { %1369 = vmatprep.mubr.msk.f32.mxu1 %vm1852_vm10, %v1845_v63 }
 0x3ec   : > { %v895_v56 = vpop.f32.mrb[0].mxu1 }
 0x3ed   : > { %v896_v57 = vadd.f32 %v895_v56, %v737_v55  ;;  %v897_v58 = vpop.f32.mrb[1].mxu1  ;;  %v980_v56 = vld [vmem:[%s2166_s8] sm:$0xff] }
 0x3ee   : > { %v1142_v58 = vld [vmem:[%s2168_s10] sm:$0x7] }
 0x3ef   : > { %vm904_vm8 = vcmp.ge.f32.partialorder %v896_v57, 0.0  ;;  %v906_v59 = vmul.f32 0.1, %v896_v57 }
 0x3f0   : > { %v900_v61 = vpop.f32.mrb[2].mxu1 }
 0x3f1   : > { %v908_v62 = vsel %vm904_vm8, %v896_v57, %v906_v59  ;;  %v901_v0 = vadd.f32 %v900_v61, %v742_v60  ;;  %v902_v1 = vpop.f32.mrb[3].mxu1  ;;  %v979_v59 = vld [vmem:[%s2165_s7 + $0x8] sm:$0xff] }
 0x3f2   : > { %v910_v2 = vmul.f32 %v2001_v6, %v908_v62  ;;  %1308 = vmatprep.mubr.msk.f32.mxu0 %vm822_vm7, %v979_v59 }
 0x3f3   : > { %vm905_vm9 = vcmp.ge.f32.partialorder %v901_v0, 0.0  ;;  %v907_v3 = vmul.f32 0.1, %v901_v0 }
 0x3f4   : > { %918 = vst.msk [vmem:[#allocation3 + $0x8] sm:$0xff] %vm662_vm3, %v910_v2 }
 0x3f5   : > { %v909_v4 = vsel %vm905_vm9, %v901_v0, %v907_v3 }
 0x3f6   : > { %v911_v5 = vmul.f32 %v2001_v6, %v909_v4 }
 0x3f8   : > { %919 = vst.msk [vmem:[#allocation3 + $0x20] sm:$0xff] %vm662_vm3, %v911_v5 }
 0x3fb   : > { %v921_v7 = vld [vmem:[#allocation3 + $0x8] sm:$0xff] }
 0x3fc   : > { %v1712_v8 = vpack.i.bf16 %v921_v7, %v1845_v63 }
 0x3fe   : > { %1713 = vrot.lane.b32.xlu1 %v1712_v8, %s1841_s24 }
 0x3ff   : > { %v923_v9 = vld [vmem:[#allocation3 + $0x20] sm:$0xff] }
 0x400   : > { %v1727_v10 = vpack.i.bf16 %v923_v9, %v1845_v63  ;;  %v1742_v11 = vpack.i.bf16 %v923_v9, %v921_v7 }
 0x402   : > { %1728 = vrot.lane.b32.xlu0 %v1727_v10, %s1841_s24  ;;  %1718 = vrot.lane.b32.xlu1 %v1712_v8, %s1846_s20 }
 0x406   : > { %1733 = vrot.lane.b32.xlu0 %v1727_v10, %s1846_s20  ;;  %1723 = vrot.lane.b32.xlu1 %v1712_v8, %s1842_s25 }
 0x40a   : > { %1738 = vrot.lane.b32.xlu0 %v1727_v10, %s1842_s25  ;;  %1743 = vrot.lane.b32.xlu1 %v1742_v11, %s1840_s23 }
 0x40e   : > { %1748 = vrot.lane.b32.xlu0 %v1742_v11, %s1847_s21  ;;  %1753 = vrot.lane.b32.xlu1 %v1742_v11, %s1850_s27 }
 0x412   : > { %1758 = vrot.lane.b32.xlu0 %v1742_v11, %s1849_s22  ;;  %1763 = vrot.lane.b32.xlu1 %v1742_v11, %s1851_s28 }
 0x416   : > { %1768 = vrot.lane.b32.xlu0 %v1712_v8, %s1843_s26  ;;  %1773 = vrot.lane.b32.xlu1 %v1727_v10, %s1843_s26 }
 0x470   : > { %v1714_v12 = vpop.permute.xlu1 %1713 }
 0x471   : > { %v1716_v13 = vunpack.i.h.bf16 %v1714_v12  ;;  %v1715_v14 = vunpack.i.l.bf16 %v1714_v12 }
 0x473   : > { %v936_v15 = vsel %vm420_vm0, %v1715_v14, %v1716_v13 }
 0x474   : > { %v1777_v16 = vpack.i.bf16 %v1716_v13, %v936_v15  ;;  %v1729_v17 = vpop.permute.xlu0 %1728  ;;  %v1719_v19 = vpop.permute.xlu1 %1718 }
 0x475   : > { %v1731_v20 = vunpack.i.h.bf16 %v1729_v17  ;;  %v1730_v21 = vunpack.i.l.bf16 %v1729_v17  ;;  %v1721_v22 = vunpack.i.h.bf16 %v1719_v19  ;;  %v1720_v23 = vunpack.i.l.bf16 %v1719_v19 }
 0x476   : > { %1778 = vrot.lane.b32.xlu0 %v1777_v16, %s1843_s26 }
 0x477   : > { %v937_v24 = vsel %vm420_vm0, %v1730_v21, %v1731_v20  ;;  %v946_v25 = vsel %vm695_vm6, %v1720_v23, %v1721_v22 }
 0x478   : > { %v1792_v26 = vpack.i.bf16 %v1731_v20, %v937_v24  ;;  %v1782_v27 = vpack.i.bf16 %v1721_v22, %v946_v25  ;;  %v1734_v28 = vpop.permute.xlu0 %1733  ;;  %v1724_v29 = vpop.permute.xlu1 %1723 }
 0x479   : > { %v1736_v30 = vunpack.i.h.bf16 %v1734_v28  ;;  %v1735_v31 = vunpack.i.l.bf16 %v1734_v28  ;;  %v1726_v32 = vunpack.i.h.bf16 %v1724_v29  ;;  %v1725_v33 = vunpack.i.l.bf16 %v1724_v29 }
 0x47a   : > { %1793 = vrot.lane.b32.xlu1 %v1792_v26, %s1843_s26  ;;  %1783 = vrot.lane.b32.xlu0 %v1782_v27, %s1843_s26 }
 0x47b   : > { %v947_v34 = vsel %vm695_vm6, %v1735_v31, %v1736_v30  ;;  %v956_v35 = vsel %vm426_vm1, %v1725_v33, %v1726_v32 }
 0x47c   : > { %v1797_v36 = vpack.i.bf16 %v1736_v30, %v947_v34  ;;  %v1787_v37 = vpack.i.bf16 %v1726_v32, %v956_v35  ;;  %v1739_v38 = vpop.permute.xlu0 %1738  ;;  %v1744_v39 = vpop.permute.xlu1 %1743 }
 0x47d   : > { %v1741_v40 = vunpack.i.h.bf16 %v1739_v38  ;;  %v1740_v41 = vunpack.i.l.bf16 %v1739_v38 }
 0x47e   : > { %1798 = vrot.lane.b32.xlu1 %v1797_v36, %s1843_s26  ;;  %1788 = vrot.lane.b32.xlu0 %v1787_v37, %s1843_s26 }
 0x47f   : > { %v957_v42 = vsel %vm426_vm1, %v1740_v41, %v1741_v40 }
 0x480   : > { %v1802_v43 = vpack.i.bf16 %v1741_v40, %v957_v42  ;;  %v1749_v44 = vpop.permute.xlu0 %1748  ;;  %v1754_v45 = vpop.permute.xlu1 %1753 }
 0x482   : > { %1803 = vrot.lane.b32.xlu1 %v1802_v43, %s1843_s26  ;;  %1808 = vrot.lane.b32.xlu0 %v1744_v39, %s1843_s26 }
 0x484   : > { %v1759_v46 = vpop.permute.xlu0 %1758  ;;  %v1764_v47 = vpop.permute.xlu1 %1763 }
 0x486   : > { %1813 = vrot.lane.b32.xlu1 %v1749_v44, %s1843_s26  ;;  %1818 = vrot.lane.b32.xlu0 %v1754_v45, %s1843_s26 }
 0x488   : > { %v1769_v48 = vpop.permute.xlu0 %1768  ;;  %v1774_v49 = vpop.permute.xlu1 %1773 }
 0x489   : > { %v1771_v50 = vunpack.i.h.bf16 %v1769_v48  ;;  %v1770_v51 = vunpack.i.l.bf16 %v1769_v48  ;;  %v1776_v52 = vunpack.i.h.bf16 %v1774_v49  ;;  %v1775_v53 = vunpack.i.l.bf16 %v1774_v49 }
 0x48a   : > { %1823 = vrot.lane.b32.xlu1 %v1759_v46, %s1843_s26  ;;  %1828 = vrot.lane.b32.xlu0 %v1764_v47, %s1843_s26  ;;  %v978_v46 = vld [vmem:[%s2165_s7] sm:$0xff] }
 0x48b   : > { %v1038_v54 = vsel %vm542_vm2, %v1770_v51, %v1771_v50  ;;  %v1039_v55 = vsel %vm542_vm2, %v1775_v53, %v1776_v52  ;;  %v1141_v53 = vld [vmem:[%s2167_s9] sm:$0x7] }
 0x48c   : > { %v1432_v57 = vpack.c.bf16 %v1039_v55, %v1038_v54  ;;  %v1222_v55 = vld [vmem:[%s397_s29] sm:$0x7] }
 0x48e   : > { %983 = vperm.xlu1 %1591, %v980_v56   ;;  %1433 = vmatpush1.bf16.msra.mxu0 %v1432_v57 }
 0x48f   : > { %1145 = vperm.xlu0 %1590, %v1142_v58   ;;  %1434 = vmatprep.subr.bf16.mxu0 %v1848_v18 }
 0x4e8   : > { %v1779_v60 = vpop.permute.xlu0 %1778 }
 0x4e9   : > { %v1781_v61 = vunpack.i.h.bf16 %v1779_v60  ;;  %v1780_v62 = vunpack.i.l.bf16 %v1779_v60 }
 0x4eb   : > { %v1040_v4 = vsel %vm542_vm2, %v1780_v62, %v1781_v61 }
 0x4ec   : > { %v1794_v0 = vpop.permute.xlu1 %1793  ;;  %v1784_v1 = vpop.permute.xlu0 %1783 }
 0x4ed   : > { %v1796_v2 = vunpack.i.h.bf16 %v1794_v0  ;;  %v1795_v3 = vunpack.i.l.bf16 %v1794_v0  ;;  %v1786_v7 = vunpack.i.h.bf16 %v1784_v1  ;;  %v1785_v8 = vunpack.i.l.bf16 %v1784_v1 }
 0x4ef   : > { %v1041_v5 = vsel %vm542_vm2, %v1795_v3, %v1796_v2  ;;  %v1042_v14 = vsel %vm542_vm2, %v1785_v8, %v1786_v7 }
 0x4f0   : > { %v1435_v9 = vpack.c.bf16 %v1041_v5, %v1040_v4  ;;  %v1799_v10 = vpop.permute.xlu1 %1798  ;;  %v1789_v11 = vpop.permute.xlu0 %1788 }
 0x4f1   : > { %v1801_v12 = vunpack.i.h.bf16 %v1799_v10  ;;  %v1800_v13 = vunpack.i.l.bf16 %v1799_v10  ;;  %v1791_v16 = vunpack.i.h.bf16 %v1789_v11  ;;  %v1790_v17 = vunpack.i.l.bf16 %v1789_v11 }
 0x4f2   : > { %1436 = vmatpush1.bf16.msra.mxu0 %v1435_v9 }
 0x4f3   : > { %v1043_v15 = vsel %vm542_vm2, %v1800_v13, %v1801_v12  ;;  %1437 = vmatprep.subr.bf16.mxu0 %v1848_v18  ;;  %v1044_v24 = vsel %vm542_vm2, %v1790_v17, %v1791_v16 }
 0x4f4   : > { %v1438_v19 = vpack.c.bf16 %v1043_v15, %v1042_v14  ;;  %v1804_v20 = vpop.permute.xlu1 %1803  ;;  %v1809_v23 = vpop.permute.xlu0 %1808 }
 0x4f5   : > { %v1806_v21 = vunpack.i.h.bf16 %v1804_v20  ;;  %v1805_v22 = vunpack.i.l.bf16 %v1804_v20  ;;  %v1811_v27 = vunpack.i.h.bf16 %v1809_v23  ;;  %v1810_v28 = vunpack.i.l.bf16 %v1809_v23 }
 0x4f6   : > { %1439 = vmatpush1.bf16.msra.mxu0 %v1438_v19 }
 0x4f7   : > { %v1045_v25 = vsel %vm542_vm2, %v1805_v22, %v1806_v21  ;;  %1440 = vmatprep.subr.bf16.mxu0 %v1848_v18  ;;  %v1444_v30 = vpack.c.bf16 %v1811_v27, %v1810_v28 }
 0x4f8   : > { %v1441_v26 = vpack.c.bf16 %v1045_v25, %v1044_v24  ;;  %v1814_v29 = vpop.permute.xlu1 %1813  ;;  %v1819_v33 = vpop.permute.xlu0 %1818 }
 0x4f9   : > { %v1816_v31 = vunpack.i.h.bf16 %v1814_v29  ;;  %v1815_v32 = vunpack.i.l.bf16 %v1814_v29  ;;  %v1821_v35 = vunpack.i.h.bf16 %v1819_v33  ;;  %v1820_v36 = vunpack.i.l.bf16 %v1819_v33 }
 0x4fa   : > { %1442 = vmatpush1.bf16.msra.mxu0 %v1441_v26 }
 0x4fb   : > { %1443 = vmatprep.subr.bf16.mxu0 %v1848_v18  ;;  %v1447_v34 = vpack.c.bf16 %v1816_v31, %v1815_v32  ;;  %v1450_v38 = vpack.c.bf16 %v1821_v35, %v1820_v36 }
 0x4fc   : > { %v1824_v37 = vpop.permute.xlu1 %1823  ;;  %v1829_v41 = vpop.permute.xlu0 %1828 }
 0x4fd   : > { %v1826_v39 = vunpack.i.h.bf16 %v1824_v37  ;;  %v1825_v40 = vunpack.i.l.bf16 %v1824_v37  ;;  %v1831_v43 = vunpack.i.h.bf16 %v1829_v41  ;;  %v1830_v44 = vunpack.i.l.bf16 %v1829_v41 }
 0x4fe   : > { %1445 = vmatpush1.bf16.msra.mxu0 %v1444_v30 }
 0x4ff   : > { %1446 = vmatprep.subr.bf16.mxu0 %v1848_v18  ;;  %v1453_v42 = vpack.c.bf16 %v1826_v39, %v1825_v40  ;;  %v1456_v45 = vpack.c.bf16 %v1831_v43, %v1830_v44 }
 0x502   : > { %1448 = vmatpush1.bf16.msra.mxu0 %v1447_v34 }
 0x503   : > { %1449 = vmatprep.subr.bf16.mxu0 %v1848_v18 }
 0x506   : > { %1451 = vmatpush1.bf16.msra.mxu0 %v1450_v38 }
 0x507   : > { %1452 = vmatprep.subr.bf16.mxu0 %v1848_v18 }
 0x50a   : > { %1454 = vmatpush1.bf16.msra.mxu0 %v1453_v42 }
 0x50b   : > { %1455 = vmatprep.subr.bf16.mxu0 %v1848_v18 }
 0x50d   : > { %v984_v47 = vpop.permute.xlu1 %983 }
 0x50e   : > { %1457 = vmatpush1.bf16.msra.mxu0 %v1456_v45  ;;  %v1146_v63 = vpop.permute.xlu0 %1145 }
 0x511   : > { %1132 = vmatmul.mubr.f32.vlgmr.msra.gmra.mrb[2].mxu0 %v978_v46 }
 0x5e4   : > { %v1133_v48 = vpop.f32.mrb[2].mxu0 }
 0x5e5   : > { %v1134_v49 = vadd.f32 %v1133_v48, %v984_v47  ;;  %v1135_v50 = vpop.f32.mrb[3].mxu0 }
 0x5e7   : > { %vm1137_vm11 = vcmp.ge.f32.partialorder %v1134_v49, 0.0  ;;  %v1138_v51 = vmul.f32 0.1, %v1134_v49 }
 0x5e9   : > { %v1139_v52 = vsel %vm1137_vm11, %v1134_v49, %v1138_v51 }
 0x5ea   : > { %v1140_v18 = vmul.f32 %v2001_v6, %v1139_v52 }
 0x5ec   : > { %1368 = vmatpush3.msra.mxu1 %v1140_v18 }
 0x5ed   : > { %1370 = vmatmul.mubr.msk.f32.vlgmr.msra.gmra.mrb[4].mxu1 %vm1148_vm12, %v1141_v53 }
 0x6c0   : > { %v1218_v54 = vpop.f32.mrb[4].mxu1 }
 0x6c1   : > { %v1219_v56 = vadd.f32 %v1218_v54, %v1146_v63  ;;  %v1371_v57 = vpop.f32.mrb[5].mxu1 }
 0x6c3   : > { %v1223_v6 = vadd.f32 %v1222_v55, %v1219_v56 }
 0x6c5   : > { %1225 = vst.msk [vmem:[%s401_s13] sm:$0x7] %vm1224_vm13, %v1223_v6 }
 0x6c6 PF: > { %s21_s17 = sadd.s32 1, %s1838_s17  }
 0x6c7   : > { %p18_p4 = scmp.ge.s32.totalorder %s21_s17, 4  }
 0x6c9   :  { %20 = sbr.rel (!%p18_p4) target bundleno = 1 (0x1), region = 100 }

</bundles_post_ra>
